<compile_context>
chip_gen: v5e
topology: v5e:2x2
jax: 0.10.0
libtpu: 0.0.40
codegen_flags: <defaults>
</compile_context>

<pallas_src>
import functools
import math

import jax
import jax.numpy as jnp
import numpy as np
from jax.experimental import pallas as pl
from jax.experimental.pallas import tpu as pltpu


def _erf(x):
    # Abramowitz & Stegun 7.1.26 rational approximation (max abs err ~1.5e-7).
    a1, a2, a3, a4, a5 = 0.254829592, -0.284496736, 1.421413741, -1.453152027, 1.061405429
    p = 0.3275911
    sign = jnp.where(x >= 0.0, 1.0, -1.0)
    ax = jnp.abs(x)
    t = 1.0 / (1.0 + p * ax)
    poly = ((((a5 * t + a4) * t + a3) * t + a2) * t + a1) * t
    return sign * (1.0 - poly * jnp.exp(-ax * ax))


def _gelu(x):
    # Exact (erf-based) GELU, matching torch.nn.GELU() default.
    return 0.5 * x * (1.0 + _erf(x * (1.0 / math.sqrt(2.0))))


def _layer_norm(x, gamma, beta, eps=1e-5):
    mu = jnp.mean(x, axis=-1, keepdims=True)
    var = jnp.mean((x - mu) ** 2, axis=-1, keepdims=True)
    return (x - mu) * jax.lax.rsqrt(var + eps) * gamma + beta


def _fan_layer_kernel(gamma_ref, x_ref,
                      wq_ref, bq_ref, wk_ref, bk_ref, wv_ref, bv_ref,
                      wo_ref, bo_ref, ln1g_ref, ln1b_ref,
                      wp_ref, bp_ref, wg_ref, bg_ref, off_ref,
                      ln2g_ref, ln2b_ref,
                      o_ref, scr_ref, *, num_heads, approx_recip):
    x = x_ref[...]                                   # (TB, L, D) f32
    TB, L, D = x.shape
    M = TB * L
    E = D // num_heads
    scale = 1.0 / math.sqrt(E)
    cd = wq_ref.dtype                                # matmul compute dtype (bf16 or f32)

    # ---- fold batch tile into the matmul M dimension -------------------------------
    xf = x.reshape(M, D)                             # f32 activations
    xc = xf.astype(cd)

    # Full-width QKV projections (one MXU matmul each, f32 accumulate).
    q = jnp.dot(xc, wq_ref[...], preferred_element_type=jnp.float32) + bq_ref[...]
    k = jnp.dot(xc, wk_ref[...], preferred_element_type=jnp.float32) + bk_ref[...]
    v = jnp.dot(xc, wv_ref[...], preferred_element_type=jnp.float32) + bv_ref[...]

    q3 = q.reshape(TB, L, D)
    k3 = k.reshape(TB, L, D)
    v3 = v.reshape(TB, L, D)

    # ---- multi-head attention: batched (over TB) dot_generals per head -------------
    # Head outputs are written into column slices of the VMEM scratch (no concatenate).
    for h in range(num_heads):                       # static unroll; head_dim is tiny
        lo = h * E
        qh = q3[:, :, lo:lo + E].astype(cd)          # (TB, L, E)
        kh = k3[:, :, lo:lo + E].astype(cd)
        vh = v3[:, :, lo:lo + E].astype(cd)
        s = jnp.einsum('ble,bse->bls', qh, kh,
                       preferred_element_type=jnp.float32) * scale     # (TB, L, L)
        s = s - jnp.max(s, axis=-1, keepdims=True)
        e = jnp.exp(s)
        inv = pl.reciprocal(jnp.sum(e, axis=-1, keepdims=True), approx=approx_recip)
        a = (e * inv).astype(cd)
        oh = jnp.einsum('bls,bse->ble', a, vh,
                        preferred_element_type=jnp.float32)            # (TB, L, E)
        scr_ref[:, lo:lo + E] = oh.reshape(M, E)

    attn = jnp.dot(scr_ref[...].astype(cd), wo_ref[...],
                   preferred_element_type=jnp.float32) + bo_ref[...]   # (M, D)

    # residual + norm1 (dropout == identity in eval)
    x1 = _layer_norm(xf + attn, ln1g_ref[...], ln1b_ref[...])

    # ---- FAN branch ------------------------------------------------------------------
    x1c = x1.astype(cd)
    p_dim = wp_ref.shape[1]
    p = jnp.dot(x1c, wp_ref[...], preferred_element_type=jnp.float32) + bp_ref[...]
    g = _gelu(jnp.dot(x1c, wg_ref[...], preferred_element_type=jnp.float32) + bg_ref[...])

    gamma = gamma_ref[0]                             # scalar sigmoid(gate), from SMEM
    off = off_ref[...]                               # (1, p_dim)

    # fan_out layout: [gamma*sin(p+off) | gamma*cos(p+pi/2-off) | (1-gamma)*gelu(g)]
    # cos(p + pi/2 - off) == -sin(p - off)  (exact identity)
    scr_ref[:, 0:p_dim] = gamma * jnp.sin(p + off)
    scr_ref[:, p_dim:2 * p_dim] = -gamma * jnp.sin(p - off)
    scr_ref[:, 2 * p_dim:D] = (1.0 - gamma) * g

    x2 = _layer_norm(x1 + scr_ref[...], ln2g_ref[...], ln2b_ref[...])
    o_ref[...] = x2.reshape(TB, L, D).astype(o_ref.dtype)


_PARAM_ORDER = ("wq", "bq", "wk", "bk", "wv", "bv", "wo", "bo",
                "ln1_g", "ln1_b", "wp", "bp", "wg", "bg",
                "offset", "ln2_g", "ln2_b")
_WEIGHT_NAMES = ("wq", "wk", "wv", "wo", "wp", "wg")


def _param_spec(arr):
    n = arr.ndim
    return pl.BlockSpec(arr.shape, lambda b, n=n: (0,) * n)


def _pick_batch_tile(B, L):
    # Fold enough batch rows to fatten the matmul M-dim (~<=256 rows), but keep >= 2
    # grid steps when B >= 2 so both v7x TensorCores get work.
    if B < 2:
        return 1
    cap = max(1, min(B // 2, max(1, 256 // max(L, 1))))
    tb = 1
    for d in range(1, cap + 1):
        if B % d == 0:
            tb = d
    return tb


def fan_transformer_layer(x, params, num_heads, *, exact=False, batch_tile=None):
    B, L, D = x.shape
    assert D % num_heads == 0 and D % 4 == 0
    TB = _pick_batch_tile(B, L) if batch_tile is None else batch_tile
    assert B % TB == 0

    w_dtype = jnp.float32 if exact else jnp.bfloat16
    gamma = jax.nn.sigmoid(params["gate"]).reshape(1).astype(jnp.float32)

    tensor_args = []
    for name in _PARAM_ORDER:
        p = params[name]
        tensor_args.append(p.astype(w_dtype) if name in _WEIGHT_NAMES else p)

    in_specs = [pl.BlockSpec(memory_space=pltpu.MemorySpace.SMEM)]        # gamma scalar
    in_specs += [pl.BlockSpec((TB, L, D), lambda b: (b, 0, 0))]           # activations
    in_specs += [_param_spec(a) for a in tensor_args]

    kernel = functools.partial(_fan_layer_kernel, num_heads=num_heads,
                               approx_recip=not exact)
    return pl.pallas_call(
        kernel,
        out_shape=jax.ShapeDtypeStruct((B, L, D), jnp.float32),
        grid=(B // TB,),
        in_specs=in_specs,
        out_specs=pl.BlockSpec((TB, L, D), lambda b: (b, 0, 0)),
        scratch_shapes=[pltpu.VMEM((TB * L, D), jnp.float32)],
        compiler_params=pltpu.CompilerParams(
            dimension_semantics=("parallel",),
            vmem_limit_bytes=32 * 1024 * 1024),
    )(gamma, x, *tensor_args)


# ----------------------------- pure-JAX reference (spec formulas, f32) ----------------
def ref_forward(x, P, num_heads):
    B, L, D = x.shape
    E = D // num_heads

    def ln(y, g, b, eps=1e-5):
        mu = jnp.mean(y, axis=-1, keepdims=True)
        var = jnp.mean((y - mu) ** 2, axis=-1, keepdims=True)
        return (y - mu) * jax.lax.rsqrt(var + eps) * g + b

    q = (x @ P["wq"] + P["bq"]).reshape(B, L, num_heads, E)
    k = (x @ P["wk"] + P["bk"]).reshape(B, L, num_heads, E)
    v = (x @ P["wv"] + P["bv"]).reshape(B, L, num_heads, E)
    s = jnp.einsum("blhe,bshe->bhls", q, k) / math.sqrt(E)
    a = jax.nn.softmax(s, axis=-1)
    o = jnp.einsum("bhls,bshe->blhe", a, v).reshape(B, L, D)
    o = o @ P["wo"] + P["bo"]
    x1 = ln(x + o, P["ln1_g"], P["ln1_b"])

    p = x1 @ P["wp"] + P["bp"]
    g = jax.nn.gelu(x1 @ P["wg"] + P["bg"], approximate=False)
    sin_part = jnp.sin(p + P["offset"])
    cos_part = jnp.cos(p + math.pi / 2.0 - P["offset"])
    gamma = jax.nn.sigmoid(P["gate"][0])
    fan = jnp.concatenate(
        [gamma * jnp.concatenate([sin_part, cos_part], axis=-1), (1.0 - gamma) * g], axis=-1)
    return ln(x1 + fan, P["ln2_g"], P["ln2_b"])


def make_params(key, hidden_dim):
    D = hidden_dim
    p_dim = D // 4
    g_dim = D // 2
    ks = jax.random.split(key, 16)

    def w(k, shape, s=0.1):
        return (s * jax.random.normal(k, shape)).astype(jnp.float32)

    return {
        "wq": w(ks[0], (D, D)), "bq": w(ks[1], (1, D), 0.02),
        "wk": w(ks[2], (D, D)), "bk": w(ks[3], (1, D), 0.02),
        "wv": w(ks[4], (D, D)), "bv": w(ks[5], (1, D), 0.02),
        "wo": w(ks[6], (D, D)), "bo": w(ks[7], (1, D), 0.02),
        "ln1_g": jnp.ones((1, D), jnp.float32), "ln1_b": jnp.zeros((1, D), jnp.float32),
        "wp": w(ks[8], (D, p_dim)), "bp": w(ks[9], (1, p_dim), 0.02),
        "wg": w(ks[10], (D, g_dim)), "bg": w(ks[11], (1, g_dim), 0.02),
        "offset": jnp.full((1, p_dim), math.pi / 4.0, jnp.float32),
        "gate": jax.random.normal(ks[12], (1,)).astype(jnp.float32),
        "ln2_g": jnp.ones((1, D), jnp.float32), "ln2_b": jnp.zeros((1, D), jnp.float32),
    }


if __name__ == "__main__":
    B, L, D, H = 2, 8, 32, 8
    key = jax.random.PRNGKey(0)
    kx, kp = jax.random.split(key)
    x = jax.random.normal(kx, (B, L, D), dtype=jnp.float32)
    params = make_params(kp, D)

    ref = jax.block_until_ready(ref_forward(x, params, H))

    # Exact-parity path: f32 matmuls + exact reciprocal.
    out_exact = jax.block_until_ready(fan_transformer_layer(x, params, H, exact=True))
    np.testing.assert_allclose(np.asarray(out_exact), np.asarray(ref), atol=1e-4, rtol=1e-4)

    # Fast path (default): bf16 matmul operands, f32 accumulate, approx softmax recip.
    out_fast = jax.block_until_ready(fan_transformer_layer(x, params, H))
    np.testing.assert_allclose(np.asarray(out_fast), np.asarray(ref), atol=5e-2, rtol=5e-2)

    print("KERNEL_OK")
</pallas_src>

<mosaic_0001>
module attributes {stable_mosaic.version = 11 : i64} {
  func.func @_fan_layer_kernel(%arg0: i32, %arg1: memref<1xf32, #tpu.memory_space<smem>>, %arg2: memref<1x8x32xf32, #tpu.memory_space<vmem>>, %arg3: memref<32x32xf32, #tpu.memory_space<vmem>>, %arg4: memref<1x32xf32, #tpu.memory_space<vmem>>, %arg5: memref<32x32xf32, #tpu.memory_space<vmem>>, %arg6: memref<1x32xf32, #tpu.memory_space<vmem>>, %arg7: memref<32x32xf32, #tpu.memory_space<vmem>>, %arg8: memref<1x32xf32, #tpu.memory_space<vmem>>, %arg9: memref<32x32xf32, #tpu.memory_space<vmem>>, %arg10: memref<1x32xf32, #tpu.memory_space<vmem>>, %arg11: memref<1x32xf32, #tpu.memory_space<vmem>>, %arg12: memref<1x32xf32, #tpu.memory_space<vmem>>, %arg13: memref<32x8xf32, #tpu.memory_space<vmem>>, %arg14: memref<1x8xf32, #tpu.memory_space<vmem>>, %arg15: memref<32x16xf32, #tpu.memory_space<vmem>>, %arg16: memref<1x16xf32, #tpu.memory_space<vmem>>, %arg17: memref<1x8xf32, #tpu.memory_space<vmem>>, %arg18: memref<1x32xf32, #tpu.memory_space<vmem>>, %arg19: memref<1x32xf32, #tpu.memory_space<vmem>>, %arg20: memref<1x8x32xf32, #tpu.memory_space<vmem>>, %arg21: memref<8x32xf32, #tpu.memory_space<vmem>>) attributes {dimension_semantics = [#tpu.dimension_semantics<parallel>], iteration_bounds = array<i64: 2>, scalar_prefetch = 0 : i64, scratch_operands = 1 : i64, tpu.core_type = #tpu.core_type<tc>, window_params = [{transform_indices = @transform_0, window_bounds = array<i64: 1>}, {transform_indices = @transform_1, window_bounds = array<i64: 1, 8, 32>}, {pipeline_mode = #tpu.pipeline_mode<synchronous>, transform_indices = @transform_2, window_bounds = array<i64: 32, 32>}, {pipeline_mode = #tpu.pipeline_mode<synchronous>, transform_indices = @transform_3, window_bounds = array<i64: 1, 32>}, {pipeline_mode = #tpu.pipeline_mode<synchronous>, transform_indices = @transform_4, window_bounds = array<i64: 32, 32>}, {pipeline_mode = #tpu.pipeline_mode<synchronous>, transform_indices = @transform_5, window_bounds = array<i64: 1, 32>}, {pipeline_mode = #tpu.pipeline_mode<synchronous>, transform_indices = @transform_6, window_bounds = array<i64: 32, 32>}, {pipeline_mode = #tpu.pipeline_mode<synchronous>, transform_indices = @transform_7, window_bounds = array<i64: 1, 32>}, {pipeline_mode = #tpu.pipeline_mode<synchronous>, transform_indices = @transform_8, window_bounds = array<i64: 32, 32>}, {pipeline_mode = #tpu.pipeline_mode<synchronous>, transform_indices = @transform_9, window_bounds = array<i64: 1, 32>}, {pipeline_mode = #tpu.pipeline_mode<synchronous>, transform_indices = @transform_10, window_bounds = array<i64: 1, 32>}, {pipeline_mode = #tpu.pipeline_mode<synchronous>, transform_indices = @transform_11, window_bounds = array<i64: 1, 32>}, {pipeline_mode = #tpu.pipeline_mode<synchronous>, transform_indices = @transform_12, window_bounds = array<i64: 32, 8>}, {pipeline_mode = #tpu.pipeline_mode<synchronous>, transform_indices = @transform_13, window_bounds = array<i64: 1, 8>}, {pipeline_mode = #tpu.pipeline_mode<synchronous>, transform_indices = @transform_14, window_bounds = array<i64: 32, 16>}, {pipeline_mode = #tpu.pipeline_mode<synchronous>, transform_indices = @transform_15, window_bounds = array<i64: 1, 16>}, {pipeline_mode = #tpu.pipeline_mode<synchronous>, transform_indices = @transform_16, window_bounds = array<i64: 1, 8>}, {pipeline_mode = #tpu.pipeline_mode<synchronous>, transform_indices = @transform_17, window_bounds = array<i64: 1, 32>}, {pipeline_mode = #tpu.pipeline_mode<synchronous>, transform_indices = @transform_18, window_bounds = array<i64: 1, 32>}, {transform_indices = @transform_19, window_bounds = array<i64: 1, 8, 32>}]} {
    %c0 = arith.constant 0 : index
    %c0_0 = arith.constant 0 : index
    %c0_1 = arith.constant 0 : index
    %0 = vector.load %arg2[%c0, %c0_0, %c0_1] : memref<1x8x32xf32, #tpu.memory_space<vmem>>, vector<1x8x32xf32>
    %1 = vector.shape_cast %0 : vector<1x8x32xf32> to vector<8x32xf32>
    %c0_2 = arith.constant 0 : index
    %c0_3 = arith.constant 0 : index
    %2 = vector.load %arg3[%c0_2, %c0_3] : memref<32x32xf32, #tpu.memory_space<vmem>>, vector<32x32xf32>
    %cst = arith.constant dense<0.000000e+00> : vector<8x32xf32>
    %3 = tpu.matmul %1, %2, %cst {dimension_numbers = #tpu.dot_dimension_numbers<[1], [0], [0], [1], [0, 0, 1, 1], [], []>} : vector<8x32xf32>, vector<32x32xf32>, vector<8x32xf32> -> vector<8x32xf32>
    %c0_4 = arith.constant 0 : index
    %c0_5 = arith.constant 0 : index
    %4 = vector.load %arg4[%c0_4, %c0_5] : memref<1x32xf32, #tpu.memory_space<vmem>>, vector<1x32xf32>
    %5 = vector.broadcast %4 : vector<1x32xf32> to vector<8x32xf32>
    %6 = arith.addf %3, %5 : vector<8x32xf32>
    %c0_6 = arith.constant 0 : index
    %c0_7 = arith.constant 0 : index
    %7 = vector.load %arg5[%c0_6, %c0_7] : memref<32x32xf32, #tpu.memory_space<vmem>>, vector<32x32xf32>
    %cst_8 = arith.constant dense<0.000000e+00> : vector<8x32xf32>
    %8 = tpu.matmul %1, %7, %cst_8 {dimension_numbers = #tpu.dot_dimension_numbers<[1], [0], [0], [1], [0, 0, 1, 1], [], []>} : vector<8x32xf32>, vector<32x32xf32>, vector<8x32xf32> -> vector<8x32xf32>
    %c0_9 = arith.constant 0 : index
    %c0_10 = arith.constant 0 : index
    %9 = vector.load %arg6[%c0_9, %c0_10] : memref<1x32xf32, #tpu.memory_space<vmem>>, vector<1x32xf32>
    %10 = vector.broadcast %9 : vector<1x32xf32> to vector<8x32xf32>
    %11 = arith.addf %8, %10 : vector<8x32xf32>
    %c0_11 = arith.constant 0 : index
    %c0_12 = arith.constant 0 : index
    %12 = vector.load %arg7[%c0_11, %c0_12] : memref<32x32xf32, #tpu.memory_space<vmem>>, vector<32x32xf32>
    %cst_13 = arith.constant dense<0.000000e+00> : vector<8x32xf32>
    %13 = tpu.matmul %1, %12, %cst_13 {dimension_numbers = #tpu.dot_dimension_numbers<[1], [0], [0], [1], [0, 0, 1, 1], [], []>} : vector<8x32xf32>, vector<32x32xf32>, vector<8x32xf32> -> vector<8x32xf32>
    %c0_14 = arith.constant 0 : index
    %c0_15 = arith.constant 0 : index
    %14 = vector.load %arg8[%c0_14, %c0_15] : memref<1x32xf32, #tpu.memory_space<vmem>>, vector<1x32xf32>
    %15 = vector.broadcast %14 : vector<1x32xf32> to vector<8x32xf32>
    %16 = arith.addf %13, %15 : vector<8x32xf32>
    %17 = vector.shape_cast %6 : vector<8x32xf32> to vector<1x8x32xf32>
    %18 = vector.shape_cast %11 : vector<8x32xf32> to vector<1x8x32xf32>
    %19 = vector.shape_cast %16 : vector<8x32xf32> to vector<1x8x32xf32>
    %20 = vector.extract_strided_slice %17 {offsets = [0, 0, 0], sizes = [1, 8, 4], strides = [1, 1, 1]} : vector<1x8x32xf32> to vector<1x8x4xf32>
    %21 = vector.extract_strided_slice %18 {offsets = [0, 0, 0], sizes = [1, 8, 4], strides = [1, 1, 1]} : vector<1x8x32xf32> to vector<1x8x4xf32>
    %22 = vector.extract_strided_slice %19 {offsets = [0, 0, 0], sizes = [1, 8, 4], strides = [1, 1, 1]} : vector<1x8x32xf32> to vector<1x8x4xf32>
    "tpu.trace_start"() <{level = 10 : i32, message = "ble,bse->bls"}> : () -> ()
    %cst_16 = arith.constant dense<0.000000e+00> : vector<1x8x8xf32>
    %23 = tpu.matmul %20, %21, %cst_16 {dimension_numbers = #tpu.dot_dimension_numbers<[2], [2], [1], [1], [0, 0, 0, 1, 1, 1], [0], [0]>} : vector<1x8x4xf32>, vector<1x8x4xf32>, vector<1x8x8xf32> -> vector<1x8x8xf32>
    "tpu.trace_stop"() : () -> ()
    %cst_17 = arith.constant 5.000000e-01 : f32
    %24 = vector.broadcast %cst_17 : f32 to vector<1x8x8xf32>
    %25 = arith.mulf %23, %24 : vector<1x8x8xf32>
    %cst_18 = arith.constant dense<0xFF800000> : vector<1x8xf32>
    %26 = vector.multi_reduction <maximumf>, %25, %cst_18 [2] : vector<1x8x8xf32> to vector<1x8xf32>
    %27 = vector.shape_cast %26 : vector<1x8xf32> to vector<1x8x1xf32>
    %28 = vector.broadcast %27 : vector<1x8x1xf32> to vector<1x8x8xf32>
    %29 = arith.subf %25, %28 : vector<1x8x8xf32>
    %30 = math.exp %29 : vector<1x8x8xf32>
    %cst_19 = arith.constant dense<0.000000e+00> : vector<1x8xf32>
    %31 = vector.multi_reduction <add>, %30, %cst_19 [2] : vector<1x8x8xf32> to vector<1x8xf32>
    %32 = vector.shape_cast %31 : vector<1x8xf32> to vector<1x8x1xf32>
    %33 = tpu.reciprocal %32 : vector<1x8x1xf32> -> vector<1x8x1xf32>
    %34 = vector.broadcast %33 : vector<1x8x1xf32> to vector<1x8x8xf32>
    %35 = arith.mulf %30, %34 : vector<1x8x8xf32>
    "tpu.trace_start"() <{level = 10 : i32, message = "bls,bse->ble"}> : () -> ()
    %cst_20 = arith.constant dense<0.000000e+00> : vector<1x8x4xf32>
    %36 = tpu.matmul %35, %22, %cst_20 {dimension_numbers = #tpu.dot_dimension_numbers<[2], [1], [1], [2], [0, 0, 0, 1, 1, 2], [0], [0]>} : vector<1x8x8xf32>, vector<1x8x4xf32>, vector<1x8x4xf32> -> vector<1x8x4xf32>
    "tpu.trace_stop"() : () -> ()
    %37 = vector.shape_cast %36 : vector<1x8x4xf32> to vector<8x4xf32>
    %c0_21 = arith.constant 0 : index
    %c0_22 = arith.constant 0 : index
    %38 = vector.load %arg21[%c0_21, %c0_22] : memref<8x32xf32, #tpu.memory_space<vmem>>, vector<8x4xf32>
    tpu.vector_store %arg21[%c0_21, %c0_22], %37 {strides = array<i32>} : memref<8x32xf32, #tpu.memory_space<vmem>>, vector<8x4xf32>,
    %39 = vector.extract_strided_slice %17 {offsets = [0, 0, 4], sizes = [1, 8, 4], strides = [1, 1, 1]} : vector<1x8x32xf32> to vector<1x8x4xf32>
    %40 = vector.extract_strided_slice %18 {offsets = [0, 0, 4], sizes = [1, 8, 4], strides = [1, 1, 1]} : vector<1x8x32xf32> to vector<1x8x4xf32>
    %41 = vector.extract_strided_slice %19 {offsets = [0, 0, 4], sizes = [1, 8, 4], strides = [1, 1, 1]} : vector<1x8x32xf32> to vector<1x8x4xf32>
    "tpu.trace_start"() <{level = 10 : i32, message = "ble,bse->bls"}> : () -> ()
    %cst_23 = arith.constant dense<0.000000e+00> : vector<1x8x8xf32>
    %42 = tpu.matmul %39, %40, %cst_23 {dimension_numbers = #tpu.dot_dimension_numbers<[2], [2], [1], [1], [0, 0, 0, 1, 1, 1], [0], [0]>} : vector<1x8x4xf32>, vector<1x8x4xf32>, vector<1x8x8xf32> -> vector<1x8x8xf32>
    "tpu.trace_stop"() : () -> ()
    %cst_24 = arith.constant 5.000000e-01 : f32
    %43 = vector.broadcast %cst_24 : f32 to vector<1x8x8xf32>
    %44 = arith.mulf %42, %43 : vector<1x8x8xf32>
    %cst_25 = arith.constant dense<0xFF800000> : vector<1x8xf32>
    %45 = vector.multi_reduction <maximumf>, %44, %cst_25 [2] : vector<1x8x8xf32> to vector<1x8xf32>
    %46 = vector.shape_cast %45 : vector<1x8xf32> to vector<1x8x1xf32>
    %47 = vector.broadcast %46 : vector<1x8x1xf32> to vector<1x8x8xf32>
    %48 = arith.subf %44, %47 : vector<1x8x8xf32>
    %49 = math.exp %48 : vector<1x8x8xf32>
    %cst_26 = arith.constant dense<0.000000e+00> : vector<1x8xf32>
    %50 = vector.multi_reduction <add>, %49, %cst_26 [2] : vector<1x8x8xf32> to vector<1x8xf32>
    %51 = vector.shape_cast %50 : vector<1x8xf32> to vector<1x8x1xf32>
    %52 = tpu.reciprocal %51 : vector<1x8x1xf32> -> vector<1x8x1xf32>
    %53 = vector.broadcast %52 : vector<1x8x1xf32> to vector<1x8x8xf32>
    %54 = arith.mulf %49, %53 : vector<1x8x8xf32>
    "tpu.trace_start"() <{level = 10 : i32, message = "bls,bse->ble"}> : () -> ()
    %cst_27 = arith.constant dense<0.000000e+00> : vector<1x8x4xf32>
    %55 = tpu.matmul %54, %41, %cst_27 {dimension_numbers = #tpu.dot_dimension_numbers<[2], [1], [1], [2], [0, 0, 0, 1, 1, 2], [0], [0]>} : vector<1x8x8xf32>, vector<1x8x4xf32>, vector<1x8x4xf32> -> vector<1x8x4xf32>
    "tpu.trace_stop"() : () -> ()
    %56 = vector.shape_cast %55 : vector<1x8x4xf32> to vector<8x4xf32>
    %c0_28 = arith.constant 0 : index
    %c4 = arith.constant 4 : index
    %57 = vector.load %arg21[%c0_28, %c4] : memref<8x32xf32, #tpu.memory_space<vmem>>, vector<8x4xf32>
    tpu.vector_store %arg21[%c0_28, %c4], %56 {strides = array<i32>} : memref<8x32xf32, #tpu.memory_space<vmem>>, vector<8x4xf32>,
    %58 = vector.extract_strided_slice %17 {offsets = [0, 0, 8], sizes = [1, 8, 4], strides = [1, 1, 1]} : vector<1x8x32xf32> to vector<1x8x4xf32>
    %59 = vector.extract_strided_slice %18 {offsets = [0, 0, 8], sizes = [1, 8, 4], strides = [1, 1, 1]} : vector<1x8x32xf32> to vector<1x8x4xf32>
    %60 = vector.extract_strided_slice %19 {offsets = [0, 0, 8], sizes = [1, 8, 4], strides = [1, 1, 1]} : vector<1x8x32xf32> to vector<1x8x4xf32>
    "tpu.trace_start"() <{level = 10 : i32, message = "ble,bse->bls"}> : () -> ()
    %cst_29 = arith.constant dense<0.000000e+00> : vector<1x8x8xf32>
    %61 = tpu.matmul %58, %59, %cst_29 {dimension_numbers = #tpu.dot_dimension_numbers<[2], [2], [1], [1], [0, 0, 0, 1, 1, 1], [0], [0]>} : vector<1x8x4xf32>, vector<1x8x4xf32>, vector<1x8x8xf32> -> vector<1x8x8xf32>
    "tpu.trace_stop"() : () -> ()
    %cst_30 = arith.constant 5.000000e-01 : f32
    %62 = vector.broadcast %cst_30 : f32 to vector<1x8x8xf32>
    %63 = arith.mulf %61, %62 : vector<1x8x8xf32>
    %cst_31 = arith.constant dense<0xFF800000> : vector<1x8xf32>
    %64 = vector.multi_reduction <maximumf>, %63, %cst_31 [2] : vector<1x8x8xf32> to vector<1x8xf32>
    %65 = vector.shape_cast %64 : vector<1x8xf32> to vector<1x8x1xf32>
    %66 = vector.broadcast %65 : vector<1x8x1xf32> to vector<1x8x8xf32>
    %67 = arith.subf %63, %66 : vector<1x8x8xf32>
    %68 = math.exp %67 : vector<1x8x8xf32>
    %cst_32 = arith.constant dense<0.000000e+00> : vector<1x8xf32>
    %69 = vector.multi_reduction <add>, %68, %cst_32 [2] : vector<1x8x8xf32> to vector<1x8xf32>
    %70 = vector.shape_cast %69 : vector<1x8xf32> to vector<1x8x1xf32>
    %71 = tpu.reciprocal %70 : vector<1x8x1xf32> -> vector<1x8x1xf32>
    %72 = vector.broadcast %71 : vector<1x8x1xf32> to vector<1x8x8xf32>
    %73 = arith.mulf %68, %72 : vector<1x8x8xf32>
    "tpu.trace_start"() <{level = 10 : i32, message = "bls,bse->ble"}> : () -> ()
    %cst_33 = arith.constant dense<0.000000e+00> : vector<1x8x4xf32>
    %74 = tpu.matmul %73, %60, %cst_33 {dimension_numbers = #tpu.dot_dimension_numbers<[2], [1], [1], [2], [0, 0, 0, 1, 1, 2], [0], [0]>} : vector<1x8x8xf32>, vector<1x8x4xf32>, vector<1x8x4xf32> -> vector<1x8x4xf32>
    "tpu.trace_stop"() : () -> ()
    %75 = vector.shape_cast %74 : vector<1x8x4xf32> to vector<8x4xf32>
    %c0_34 = arith.constant 0 : index
    %c8 = arith.constant 8 : index
    %76 = vector.load %arg21[%c0_34, %c8] : memref<8x32xf32, #tpu.memory_space<vmem>>, vector<8x4xf32>
    tpu.vector_store %arg21[%c0_34, %c8], %75 {strides = array<i32>} : memref<8x32xf32, #tpu.memory_space<vmem>>, vector<8x4xf32>,
    %77 = vector.extract_strided_slice %17 {offsets = [0, 0, 12], sizes = [1, 8, 4], strides = [1, 1, 1]} : vector<1x8x32xf32> to vector<1x8x4xf32>
    %78 = vector.extract_strided_slice %18 {offsets = [0, 0, 12], sizes = [1, 8, 4], strides = [1, 1, 1]} : vector<1x8x32xf32> to vector<1x8x4xf32>
    %79 = vector.extract_strided_slice %19 {offsets = [0, 0, 12], sizes = [1, 8, 4], strides = [1, 1, 1]} : vector<1x8x32xf32> to vector<1x8x4xf32>
    "tpu.trace_start"() <{level = 10 : i32, message = "ble,bse->bls"}> : () -> ()
    %cst_35 = arith.constant dense<0.000000e+00> : vector<1x8x8xf32>
    %80 = tpu.matmul %77, %78, %cst_35 {dimension_numbers = #tpu.dot_dimension_numbers<[2], [2], [1], [1], [0, 0, 0, 1, 1, 1], [0], [0]>} : vector<1x8x4xf32>, vector<1x8x4xf32>, vector<1x8x8xf32> -> vector<1x8x8xf32>
    "tpu.trace_stop"() : () -> ()
    %cst_36 = arith.constant 5.000000e-01 : f32
    %81 = vector.broadcast %cst_36 : f32 to vector<1x8x8xf32>
    %82 = arith.mulf %80, %81 : vector<1x8x8xf32>
    %cst_37 = arith.constant dense<0xFF800000> : vector<1x8xf32>
    %83 = vector.multi_reduction <maximumf>, %82, %cst_37 [2] : vector<1x8x8xf32> to vector<1x8xf32>
    %84 = vector.shape_cast %83 : vector<1x8xf32> to vector<1x8x1xf32>
    %85 = vector.broadcast %84 : vector<1x8x1xf32> to vector<1x8x8xf32>
    %86 = arith.subf %82, %85 : vector<1x8x8xf32>
    %87 = math.exp %86 : vector<1x8x8xf32>
    %cst_38 = arith.constant dense<0.000000e+00> : vector<1x8xf32>
    %88 = vector.multi_reduction <add>, %87, %cst_38 [2] : vector<1x8x8xf32> to vector<1x8xf32>
    %89 = vector.shape_cast %88 : vector<1x8xf32> to vector<1x8x1xf32>
    %90 = tpu.reciprocal %89 : vector<1x8x1xf32> -> vector<1x8x1xf32>
    %91 = vector.broadcast %90 : vector<1x8x1xf32> to vector<1x8x8xf32>
    %92 = arith.mulf %87, %91 : vector<1x8x8xf32>
    "tpu.trace_start"() <{level = 10 : i32, message = "bls,bse->ble"}> : () -> ()
    %cst_39 = arith.constant dense<0.000000e+00> : vector<1x8x4xf32>
    %93 = tpu.matmul %92, %79, %cst_39 {dimension_numbers = #tpu.dot_dimension_numbers<[2], [1], [1], [2], [0, 0, 0, 1, 1, 2], [0], [0]>} : vector<1x8x8xf32>, vector<1x8x4xf32>, vector<1x8x4xf32> -> vector<1x8x4xf32>
    "tpu.trace_stop"() : () -> ()
    %94 = vector.shape_cast %93 : vector<1x8x4xf32> to vector<8x4xf32>
    %c0_40 = arith.constant 0 : index
    %c12 = arith.constant 12 : index
    %95 = vector.load %arg21[%c0_40, %c12] : memref<8x32xf32, #tpu.memory_space<vmem>>, vector<8x4xf32>
    tpu.vector_store %arg21[%c0_40, %c12], %94 {strides = array<i32>} : memref<8x32xf32, #tpu.memory_space<vmem>>, vector<8x4xf32>,
    %96 = vector.extract_strided_slice %17 {offsets = [0, 0, 16], sizes = [1, 8, 4], strides = [1, 1, 1]} : vector<1x8x32xf32> to vector<1x8x4xf32>
    %97 = vector.extract_strided_slice %18 {offsets = [0, 0, 16], sizes = [1, 8, 4], strides = [1, 1, 1]} : vector<1x8x32xf32> to vector<1x8x4xf32>
    %98 = vector.extract_strided_slice %19 {offsets = [0, 0, 16], sizes = [1, 8, 4], strides = [1, 1, 1]} : vector<1x8x32xf32> to vector<1x8x4xf32>
    "tpu.trace_start"() <{level = 10 : i32, message = "ble,bse->bls"}> : () -> ()
    %cst_41 = arith.constant dense<0.000000e+00> : vector<1x8x8xf32>
    %99 = tpu.matmul %96, %97, %cst_41 {dimension_numbers = #tpu.dot_dimension_numbers<[2], [2], [1], [1], [0, 0, 0, 1, 1, 1], [0], [0]>} : vector<1x8x4xf32>, vector<1x8x4xf32>, vector<1x8x8xf32> -> vector<1x8x8xf32>
    "tpu.trace_stop"() : () -> ()
    %cst_42 = arith.constant 5.000000e-01 : f32
    %100 = vector.broadcast %cst_42 : f32 to vector<1x8x8xf32>
    %101 = arith.mulf %99, %100 : vector<1x8x8xf32>
    %cst_43 = arith.constant dense<0xFF800000> : vector<1x8xf32>
    %102 = vector.multi_reduction <maximumf>, %101, %cst_43 [2] : vector<1x8x8xf32> to vector<1x8xf32>
    %103 = vector.shape_cast %102 : vector<1x8xf32> to vector<1x8x1xf32>
    %104 = vector.broadcast %103 : vector<1x8x1xf32> to vector<1x8x8xf32>
    %105 = arith.subf %101, %104 : vector<1x8x8xf32>
    %106 = math.exp %105 : vector<1x8x8xf32>
    %cst_44 = arith.constant dense<0.000000e+00> : vector<1x8xf32>
    %107 = vector.multi_reduction <add>, %106, %cst_44 [2] : vector<1x8x8xf32> to vector<1x8xf32>
    %108 = vector.shape_cast %107 : vector<1x8xf32> to vector<1x8x1xf32>
    %109 = tpu.reciprocal %108 : vector<1x8x1xf32> -> vector<1x8x1xf32>
    %110 = vector.broadcast %109 : vector<1x8x1xf32> to vector<1x8x8xf32>
    %111 = arith.mulf %106, %110 : vector<1x8x8xf32>
    "tpu.trace_start"() <{level = 10 : i32, message = "bls,bse->ble"}> : () -> ()
    %cst_45 = arith.constant dense<0.000000e+00> : vector<1x8x4xf32>
    %112 = tpu.matmul %111, %98, %cst_45 {dimension_numbers = #tpu.dot_dimension_numbers<[2], [1], [1], [2], [0, 0, 0, 1, 1, 2], [0], [0]>} : vector<1x8x8xf32>, vector<1x8x4xf32>, vector<1x8x4xf32> -> vector<1x8x4xf32>
    "tpu.trace_stop"() : () -> ()
    %113 = vector.shape_cast %112 : vector<1x8x4xf32> to vector<8x4xf32>
    %c0_46 = arith.constant 0 : index
    %c16 = arith.constant 16 : index
    %114 = vector.load %arg21[%c0_46, %c16] : memref<8x32xf32, #tpu.memory_space<vmem>>, vector<8x4xf32>
    tpu.vector_store %arg21[%c0_46, %c16], %113 {strides = array<i32>} : memref<8x32xf32, #tpu.memory_space<vmem>>, vector<8x4xf32>,
    %115 = vector.extract_strided_slice %17 {offsets = [0, 0, 20], sizes = [1, 8, 4], strides = [1, 1, 1]} : vector<1x8x32xf32> to vector<1x8x4xf32>
    %116 = vector.extract_strided_slice %18 {offsets = [0, 0, 20], sizes = [1, 8, 4], strides = [1, 1, 1]} : vector<1x8x32xf32> to vector<1x8x4xf32>
    %117 = vector.extract_strided_slice %19 {offsets = [0, 0, 20], sizes = [1, 8, 4], strides = [1, 1, 1]} : vector<1x8x32xf32> to vector<1x8x4xf32>
    "tpu.trace_start"() <{level = 10 : i32, message = "ble,bse->bls"}> : () -> ()
    %cst_47 = arith.constant dense<0.000000e+00> : vector<1x8x8xf32>
    %118 = tpu.matmul %115, %116, %cst_47 {dimension_numbers = #tpu.dot_dimension_numbers<[2], [2], [1], [1], [0, 0, 0, 1, 1, 1], [0], [0]>} : vector<1x8x4xf32>, vector<1x8x4xf32>, vector<1x8x8xf32> -> vector<1x8x8xf32>
    "tpu.trace_stop"() : () -> ()
    %cst_48 = arith.constant 5.000000e-01 : f32
    %119 = vector.broadcast %cst_48 : f32 to vector<1x8x8xf32>
    %120 = arith.mulf %118, %119 : vector<1x8x8xf32>
    %cst_49 = arith.constant dense<0xFF800000> : vector<1x8xf32>
    %121 = vector.multi_reduction <maximumf>, %120, %cst_49 [2] : vector<1x8x8xf32> to vector<1x8xf32>
    %122 = vector.shape_cast %121 : vector<1x8xf32> to vector<1x8x1xf32>
    %123 = vector.broadcast %122 : vector<1x8x1xf32> to vector<1x8x8xf32>
    %124 = arith.subf %120, %123 : vector<1x8x8xf32>
    %125 = math.exp %124 : vector<1x8x8xf32>
    %cst_50 = arith.constant dense<0.000000e+00> : vector<1x8xf32>
    %126 = vector.multi_reduction <add>, %125, %cst_50 [2] : vector<1x8x8xf32> to vector<1x8xf32>
    %127 = vector.shape_cast %126 : vector<1x8xf32> to vector<1x8x1xf32>
    %128 = tpu.reciprocal %127 : vector<1x8x1xf32> -> vector<1x8x1xf32>
    %129 = vector.broadcast %128 : vector<1x8x1xf32> to vector<1x8x8xf32>
    %130 = arith.mulf %125, %129 : vector<1x8x8xf32>
    "tpu.trace_start"() <{level = 10 : i32, message = "bls,bse->ble"}> : () -> ()
    %cst_51 = arith.constant dense<0.000000e+00> : vector<1x8x4xf32>
    %131 = tpu.matmul %130, %117, %cst_51 {dimension_numbers = #tpu.dot_dimension_numbers<[2], [1], [1], [2], [0, 0, 0, 1, 1, 2], [0], [0]>} : vector<1x8x8xf32>, vector<1x8x4xf32>, vector<1x8x4xf32> -> vector<1x8x4xf32>
    "tpu.trace_stop"() : () -> ()
    %132 = vector.shape_cast %131 : vector<1x8x4xf32> to vector<8x4xf32>
    %c0_52 = arith.constant 0 : index
    %c20 = arith.constant 20 : index
    %133 = vector.load %arg21[%c0_52, %c20] : memref<8x32xf32, #tpu.memory_space<vmem>>, vector<8x4xf32>
    tpu.vector_store %arg21[%c0_52, %c20], %132 {strides = array<i32>} : memref<8x32xf32, #tpu.memory_space<vmem>>, vector<8x4xf32>,
    %134 = vector.extract_strided_slice %17 {offsets = [0, 0, 24], sizes = [1, 8, 4], strides = [1, 1, 1]} : vector<1x8x32xf32> to vector<1x8x4xf32>
    %135 = vector.extract_strided_slice %18 {offsets = [0, 0, 24], sizes = [1, 8, 4], strides = [1, 1, 1]} : vector<1x8x32xf32> to vector<1x8x4xf32>
    %136 = vector.extract_strided_slice %19 {offsets = [0, 0, 24], sizes = [1, 8, 4], strides = [1, 1, 1]} : vector<1x8x32xf32> to vector<1x8x4xf32>
    "tpu.trace_start"() <{level = 10 : i32, message = "ble,bse->bls"}> : () -> ()
    %cst_53 = arith.constant dense<0.000000e+00> : vector<1x8x8xf32>
    %137 = tpu.matmul %134, %135, %cst_53 {dimension_numbers = #tpu.dot_dimension_numbers<[2], [2], [1], [1], [0, 0, 0, 1, 1, 1], [0], [0]>} : vector<1x8x4xf32>, vector<1x8x4xf32>, vector<1x8x8xf32> -> vector<1x8x8xf32>
    "tpu.trace_stop"() : () -> ()
    %cst_54 = arith.constant 5.000000e-01 : f32
    %138 = vector.broadcast %cst_54 : f32 to vector<1x8x8xf32>
    %139 = arith.mulf %137, %138 : vector<1x8x8xf32>
    %cst_55 = arith.constant dense<0xFF800000> : vector<1x8xf32>
    %140 = vector.multi_reduction <maximumf>, %139, %cst_55 [2] : vector<1x8x8xf32> to vector<1x8xf32>
    %141 = vector.shape_cast %140 : vector<1x8xf32> to vector<1x8x1xf32>
    %142 = vector.broadcast %141 : vector<1x8x1xf32> to vector<1x8x8xf32>
    %143 = arith.subf %139, %142 : vector<1x8x8xf32>
    %144 = math.exp %143 : vector<1x8x8xf32>
    %cst_56 = arith.constant dense<0.000000e+00> : vector<1x8xf32>
    %145 = vector.multi_reduction <add>, %144, %cst_56 [2] : vector<1x8x8xf32> to vector<1x8xf32>
    %146 = vector.shape_cast %145 : vector<1x8xf32> to vector<1x8x1xf32>
    %147 = tpu.reciprocal %146 : vector<1x8x1xf32> -> vector<1x8x1xf32>
    %148 = vector.broadcast %147 : vector<1x8x1xf32> to vector<1x8x8xf32>
    %149 = arith.mulf %144, %148 : vector<1x8x8xf32>
    "tpu.trace_start"() <{level = 10 : i32, message = "bls,bse->ble"}> : () -> ()
    %cst_57 = arith.constant dense<0.000000e+00> : vector<1x8x4xf32>
    %150 = tpu.matmul %149, %136, %cst_57 {dimension_numbers = #tpu.dot_dimension_numbers<[2], [1], [1], [2], [0, 0, 0, 1, 1, 2], [0], [0]>} : vector<1x8x8xf32>, vector<1x8x4xf32>, vector<1x8x4xf32> -> vector<1x8x4xf32>
    "tpu.trace_stop"() : () -> ()
    %151 = vector.shape_cast %150 : vector<1x8x4xf32> to vector<8x4xf32>
    %c0_58 = arith.constant 0 : index
    %c24 = arith.constant 24 : index
    %152 = vector.load %arg21[%c0_58, %c24] : memref<8x32xf32, #tpu.memory_space<vmem>>, vector<8x4xf32>
    tpu.vector_store %arg21[%c0_58, %c24], %151 {strides = array<i32>} : memref<8x32xf32, #tpu.memory_space<vmem>>, vector<8x4xf32>,
    %153 = vector.extract_strided_slice %17 {offsets = [0, 0, 28], sizes = [1, 8, 4], strides = [1, 1, 1]} : vector<1x8x32xf32> to vector<1x8x4xf32>
    %154 = vector.extract_strided_slice %18 {offsets = [0, 0, 28], sizes = [1, 8, 4], strides = [1, 1, 1]} : vector<1x8x32xf32> to vector<1x8x4xf32>
    %155 = vector.extract_strided_slice %19 {offsets = [0, 0, 28], sizes = [1, 8, 4], strides = [1, 1, 1]} : vector<1x8x32xf32> to vector<1x8x4xf32>
    "tpu.trace_start"() <{level = 10 : i32, message = "ble,bse->bls"}> : () -> ()
    %cst_59 = arith.constant dense<0.000000e+00> : vector<1x8x8xf32>
    %156 = tpu.matmul %153, %154, %cst_59 {dimension_numbers = #tpu.dot_dimension_numbers<[2], [2], [1], [1], [0, 0, 0, 1, 1, 1], [0], [0]>} : vector<1x8x4xf32>, vector<1x8x4xf32>, vector<1x8x8xf32> -> vector<1x8x8xf32>
    "tpu.trace_stop"() : () -> ()
    %cst_60 = arith.constant 5.000000e-01 : f32
    %157 = vector.broadcast %cst_60 : f32 to vector<1x8x8xf32>
    %158 = arith.mulf %156, %157 : vector<1x8x8xf32>
    %cst_61 = arith.constant dense<0xFF800000> : vector<1x8xf32>
    %159 = vector.multi_reduction <maximumf>, %158, %cst_61 [2] : vector<1x8x8xf32> to vector<1x8xf32>
    %160 = vector.shape_cast %159 : vector<1x8xf32> to vector<1x8x1xf32>
    %161 = vector.broadcast %160 : vector<1x8x1xf32> to vector<1x8x8xf32>
    %162 = arith.subf %158, %161 : vector<1x8x8xf32>
    %163 = math.exp %162 : vector<1x8x8xf32>
    %cst_62 = arith.constant dense<0.000000e+00> : vector<1x8xf32>
    %164 = vector.multi_reduction <add>, %163, %cst_62 [2] : vector<1x8x8xf32> to vector<1x8xf32>
    %165 = vector.shape_cast %164 : vector<1x8xf32> to vector<1x8x1xf32>
    %166 = tpu.reciprocal %165 : vector<1x8x1xf32> -> vector<1x8x1xf32>
    %167 = vector.broadcast %166 : vector<1x8x1xf32> to vector<1x8x8xf32>
    %168 = arith.mulf %163, %167 : vector<1x8x8xf32>
    "tpu.trace_start"() <{level = 10 : i32, message = "bls,bse->ble"}> : () -> ()
    %cst_63 = arith.constant dense<0.000000e+00> : vector<1x8x4xf32>
    %169 = tpu.matmul %168, %155, %cst_63 {dimension_numbers = #tpu.dot_dimension_numbers<[2], [1], [1], [2], [0, 0, 0, 1, 1, 2], [0], [0]>} : vector<1x8x8xf32>, vector<1x8x4xf32>, vector<1x8x4xf32> -> vector<1x8x4xf32>
    "tpu.trace_stop"() : () -> ()
    %170 = vector.shape_cast %169 : vector<1x8x4xf32> to vector<8x4xf32>
    %c0_64 = arith.constant 0 : index
    %c28 = arith.constant 28 : index
    %171 = vector.load %arg21[%c0_64, %c28] : memref<8x32xf32, #tpu.memory_space<vmem>>, vector<8x4xf32>
    tpu.vector_store %arg21[%c0_64, %c28], %170 {strides = array<i32>} : memref<8x32xf32, #tpu.memory_space<vmem>>, vector<8x4xf32>,
    %c0_65 = arith.constant 0 : index
    %c0_66 = arith.constant 0 : index
    %172 = vector.load %arg21[%c0_65, %c0_66] : memref<8x32xf32, #tpu.memory_space<vmem>>, vector<8x32xf32>
    %c0_67 = arith.constant 0 : index
    %c0_68 = arith.constant 0 : index
    %173 = vector.load %arg9[%c0_67, %c0_68] : memref<32x32xf32, #tpu.memory_space<vmem>>, vector<32x32xf32>
    %cst_69 = arith.constant dense<0.000000e+00> : vector<8x32xf32>
    %174 = tpu.matmul %172, %173, %cst_69 {dimension_numbers = #tpu.dot_dimension_numbers<[1], [0], [0], [1], [0, 0, 1, 1], [], []>} : vector<8x32xf32>, vector<32x32xf32>, vector<8x32xf32> -> vector<8x32xf32>
    %c0_70 = arith.constant 0 : index
    %c0_71 = arith.constant 0 : index
    %175 = vector.load %arg10[%c0_70, %c0_71] : memref<1x32xf32, #tpu.memory_space<vmem>>, vector<1x32xf32>
    %176 = vector.broadcast %175 : vector<1x32xf32> to vector<8x32xf32>
    %177 = arith.addf %174, %176 : vector<8x32xf32>
    %178 = arith.addf %1, %177 : vector<8x32xf32>
    %c0_72 = arith.constant 0 : index
    %c0_73 = arith.constant 0 : index
    %179 = vector.load %arg11[%c0_72, %c0_73] : memref<1x32xf32, #tpu.memory_space<vmem>>, vector<1x32xf32>
    %c0_74 = arith.constant 0 : index
    %c0_75 = arith.constant 0 : index
    %180 = vector.load %arg12[%c0_74, %c0_75] : memref<1x32xf32, #tpu.memory_space<vmem>>, vector<1x32xf32>
    %cst_76 = arith.constant dense<0.000000e+00> : vector<8xf32>
    %181 = vector.multi_reduction <add>, %178, %cst_76 [1] : vector<8x32xf32> to vector<8xf32>
    %182 = vector.shape_cast %181 : vector<8xf32> to vector<8x1xf32>
    %cst_77 = arith.constant 3.200000e+01 : f32
    %183 = vector.broadcast %cst_77 : f32 to vector<8x1xf32>
    %184 = arith.divf %182, %183 : vector<8x1xf32>
    %185 = vector.broadcast %184 : vector<8x1xf32> to vector<8x32xf32>
    %186 = arith.subf %178, %185 : vector<8x32xf32>
    %187 = arith.mulf %186, %186 : vector<8x32xf32>
    %cst_78 = arith.constant dense<0.000000e+00> : vector<8xf32>
    %188 = vector.multi_reduction <add>, %187, %cst_78 [1] : vector<8x32xf32> to vector<8xf32>
    %189 = vector.shape_cast %188 : vector<8xf32> to vector<8x1xf32>
    %cst_79 = arith.constant 3.200000e+01 : f32
    %190 = vector.broadcast %cst_79 : f32 to vector<8x1xf32>
    %191 = arith.divf %189, %190 : vector<8x1xf32>
    %192 = vector.broadcast %184 : vector<8x1xf32> to vector<8x32xf32>
    %193 = arith.subf %178, %192 : vector<8x32xf32>
    %cst_80 = arith.constant 9.99999974E-6 : f32
    %194 = vector.broadcast %cst_80 : f32 to vector<8x1xf32>
    %195 = arith.addf %191, %194 : vector<8x1xf32>
    %196 = math.rsqrt %195 : vector<8x1xf32>
    %197 = vector.broadcast %196 : vector<8x1xf32> to vector<8x32xf32>
    %198 = arith.mulf %193, %197 : vector<8x32xf32>
    %199 = vector.broadcast %179 : vector<1x32xf32> to vector<8x32xf32>
    %200 = arith.mulf %198, %199 : vector<8x32xf32>
    %201 = vector.broadcast %180 : vector<1x32xf32> to vector<8x32xf32>
    %202 = arith.addf %200, %201 : vector<8x32xf32>
    %c0_81 = arith.constant 0 : index
    %c0_82 = arith.constant 0 : index
    %203 = vector.load %arg13[%c0_81, %c0_82] : memref<32x8xf32, #tpu.memory_space<vmem>>, vector<32x8xf32>
    %cst_83 = arith.constant dense<0.000000e+00> : vector<8x8xf32>
    %204 = tpu.matmul %202, %203, %cst_83 {dimension_numbers = #tpu.dot_dimension_numbers<[1], [0], [0], [1], [0, 0, 1, 1], [], []>} : vector<8x32xf32>, vector<32x8xf32>, vector<8x8xf32> -> vector<8x8xf32>
    %c0_84 = arith.constant 0 : index
    %c0_85 = arith.constant 0 : index
    %205 = vector.load %arg14[%c0_84, %c0_85] : memref<1x8xf32, #tpu.memory_space<vmem>>, vector<1x8xf32>
    %206 = vector.broadcast %205 : vector<1x8xf32> to vector<8x8xf32>
    %207 = arith.addf %204, %206 : vector<8x8xf32>
    %c0_86 = arith.constant 0 : index
    %c0_87 = arith.constant 0 : index
    %208 = vector.load %arg15[%c0_86, %c0_87] : memref<32x16xf32, #tpu.memory_space<vmem>>, vector<32x16xf32>
    %cst_88 = arith.constant dense<0.000000e+00> : vector<8x16xf32>
    %209 = tpu.matmul %202, %208, %cst_88 {dimension_numbers = #tpu.dot_dimension_numbers<[1], [0], [0], [1], [0, 0, 1, 1], [], []>} : vector<8x32xf32>, vector<32x16xf32>, vector<8x16xf32> -> vector<8x16xf32>
    %c0_89 = arith.constant 0 : index
    %c0_90 = arith.constant 0 : index
    %210 = vector.load %arg16[%c0_89, %c0_90] : memref<1x16xf32, #tpu.memory_space<vmem>>, vector<1x16xf32>
    %211 = vector.broadcast %210 : vector<1x16xf32> to vector<8x16xf32>
    %212 = arith.addf %209, %211 : vector<8x16xf32>
    %cst_91 = arith.constant 5.000000e-01 : f32
    %213 = vector.broadcast %cst_91 : f32 to vector<8x16xf32>
    %214 = arith.mulf %213, %212 : vector<8x16xf32>
    %cst_92 = arith.constant 0.707106769 : f32
    %215 = vector.broadcast %cst_92 : f32 to vector<8x16xf32>
    %216 = arith.mulf %212, %215 : vector<8x16xf32>
    %cst_93 = arith.constant 0.000000e+00 : f32
    %217 = vector.broadcast %cst_93 : f32 to vector<8x16xf32>
    %218 = arith.cmpf oge, %216, %217 : vector<8x16xf32>
    %cst_94 = arith.constant 1.000000e+00 : f32
    %cst_95 = arith.constant -1.000000e+00 : f32
    %219 = vector.broadcast %cst_94 : f32 to vector<8x16xf32>
    %220 = vector.broadcast %cst_95 : f32 to vector<8x16xf32>
    %221 = arith.select %218, %219, %220 : vector<8x16xi1>, vector<8x16xf32>
    %222 = math.absf %216 : vector<8x16xf32>
    %cst_96 = arith.constant 0.327591091 : f32
    %223 = vector.broadcast %cst_96 : f32 to vector<8x16xf32>
    %224 = arith.mulf %223, %222 : vector<8x16xf32>
    %cst_97 = arith.constant 1.000000e+00 : f32
    %225 = vector.broadcast %cst_97 : f32 to vector<8x16xf32>
    %226 = arith.addf %225, %224 : vector<8x16xf32>
    %cst_98 = arith.constant 1.000000e+00 : f32
    %227 = vector.broadcast %cst_98 : f32 to vector<8x16xf32>
    %228 = arith.divf %227, %226 : vector<8x16xf32>
    %cst_99 = arith.constant 1.06140542 : f32
    %229 = vector.broadcast %cst_99 : f32 to vector<8x16xf32>
    %230 = arith.mulf %229, %228 : vector<8x16xf32>
    %cst_100 = arith.constant -1.45315206 : f32
    %231 = vector.broadcast %cst_100 : f32 to vector<8x16xf32>
    %232 = arith.addf %230, %231 : vector<8x16xf32>
    %233 = arith.mulf %232, %228 : vector<8x16xf32>
    %cst_101 = arith.constant 1.42141378 : f32
    %234 = vector.broadcast %cst_101 : f32 to vector<8x16xf32>
    %235 = arith.addf %233, %234 : vector<8x16xf32>
    %236 = arith.mulf %235, %228 : vector<8x16xf32>
    %cst_102 = arith.constant -0.284496725 : f32
    %237 = vector.broadcast %cst_102 : f32 to vector<8x16xf32>
    %238 = arith.addf %236, %237 : vector<8x16xf32>
    %239 = arith.mulf %238, %228 : vector<8x16xf32>
    %cst_103 = arith.constant 0.254829586 : f32
    %240 = vector.broadcast %cst_103 : f32 to vector<8x16xf32>
    %241 = arith.addf %239, %240 : vector<8x16xf32>
    %242 = arith.mulf %241, %228 : vector<8x16xf32>
    %cst_104 = arith.constant 0.000000e+00 : f32
    %243 = vector.broadcast %cst_104 : f32 to vector<8x16xf32>
    %244 = arith.subf %243, %222 : vector<8x16xf32>
    %245 = arith.mulf %244, %222 : vector<8x16xf32>
    %246 = math.exp %245 : vector<8x16xf32>
    %247 = arith.mulf %242, %246 : vector<8x16xf32>
    %cst_105 = arith.constant 1.000000e+00 : f32
    %248 = vector.broadcast %cst_105 : f32 to vector<8x16xf32>
    %249 = arith.subf %248, %247 : vector<8x16xf32>
    %250 = arith.mulf %221, %249 : vector<8x16xf32>
    %cst_106 = arith.constant 1.000000e+00 : f32
    %251 = vector.broadcast %cst_106 : f32 to vector<8x16xf32>
    %252 = arith.addf %251, %250 : vector<8x16xf32>
    %253 = arith.mulf %214, %252 : vector<8x16xf32>
    %c0_107 = arith.constant 0 : index
    %254 = memref.load %arg1[%c0_107] : memref<1xf32, #tpu.memory_space<smem>>
    %c0_108 = arith.constant 0 : index
    %c0_109 = arith.constant 0 : index
    %255 = vector.load %arg17[%c0_108, %c0_109] : memref<1x8xf32, #tpu.memory_space<vmem>>, vector<1x8xf32>
    %256 = vector.broadcast %255 : vector<1x8xf32> to vector<8x8xf32>
    %257 = arith.addf %207, %256 : vector<8x8xf32>
    %258 = math.sin %257 : vector<8x8xf32>
    %259 = vector.broadcast %254 : f32 to vector<8x8xf32>
    %260 = arith.mulf %259, %258 : vector<8x8xf32>
    %c0_110 = arith.constant 0 : index
    %c0_111 = arith.constant 0 : index
    %261 = vector.load %arg21[%c0_110, %c0_111] : memref<8x32xf32, #tpu.memory_space<vmem>>, vector<8x8xf32>
    tpu.vector_store %arg21[%c0_110, %c0_111], %260 {strides = array<i32>} : memref<8x32xf32, #tpu.memory_space<vmem>>, vector<8x8xf32>,
    %cst_112 = arith.constant 0.000000e+00 : f32
    %262 = arith.subf %cst_112, %254 : f32
    %263 = vector.broadcast %255 : vector<1x8xf32> to vector<8x8xf32>
    %264 = arith.subf %207, %263 : vector<8x8xf32>
    %265 = math.sin %264 : vector<8x8xf32>
    %266 = vector.broadcast %262 : f32 to vector<8x8xf32>
    %267 = arith.mulf %266, %265 : vector<8x8xf32>
    %c0_113 = arith.constant 0 : index
    %c8_114 = arith.constant 8 : index
    %268 = vector.load %arg21[%c0_113, %c8_114] : memref<8x32xf32, #tpu.memory_space<vmem>>, vector<8x8xf32>
    tpu.vector_store %arg21[%c0_113, %c8_114], %267 {strides = array<i32>} : memref<8x32xf32, #tpu.memory_space<vmem>>, vector<8x8xf32>,
    %cst_115 = arith.constant 1.000000e+00 : f32
    %269 = arith.subf %cst_115, %254 : f32
    %270 = vector.broadcast %269 : f32 to vector<8x16xf32>
    %271 = arith.mulf %270, %253 : vector<8x16xf32>
    %c0_116 = arith.constant 0 : index
    %c16_117 = arith.constant 16 : index
    %272 = vector.load %arg21[%c0_116, %c16_117] : memref<8x32xf32, #tpu.memory_space<vmem>>, vector<8x16xf32>
    tpu.vector_store %arg21[%c0_116, %c16_117], %271 {strides = array<i32>} : memref<8x32xf32, #tpu.memory_space<vmem>>, vector<8x16xf32>,
    %c0_118 = arith.constant 0 : index
    %c0_119 = arith.constant 0 : index
    %273 = vector.load %arg21[%c0_118, %c0_119] : memref<8x32xf32, #tpu.memory_space<vmem>>, vector<8x32xf32>
    %274 = arith.addf %202, %273 : vector<8x32xf32>
    %c0_120 = arith.constant 0 : index
    %c0_121 = arith.constant 0 : index
    %275 = vector.load %arg18[%c0_120, %c0_121] : memref<1x32xf32, #tpu.memory_space<vmem>>, vector<1x32xf32>
    %c0_122 = arith.constant 0 : index
    %c0_123 = arith.constant 0 : index
    %276 = vector.load %arg19[%c0_122, %c0_123] : memref<1x32xf32, #tpu.memory_space<vmem>>, vector<1x32xf32>
    %cst_124 = arith.constant dense<0.000000e+00> : vector<8xf32>
    %277 = vector.multi_reduction <add>, %274, %cst_124 [1] : vector<8x32xf32> to vector<8xf32>
    %278 = vector.shape_cast %277 : vector<8xf32> to vector<8x1xf32>
    %cst_125 = arith.constant 3.200000e+01 : f32
    %279 = vector.broadcast %cst_125 : f32 to vector<8x1xf32>
    %280 = arith.divf %278, %279 : vector<8x1xf32>
    %281 = vector.broadcast %280 : vector<8x1xf32> to vector<8x32xf32>
    %282 = arith.subf %274, %281 : vector<8x32xf32>
    %283 = arith.mulf %282, %282 : vector<8x32xf32>
    %cst_126 = arith.constant dense<0.000000e+00> : vector<8xf32>
    %284 = vector.multi_reduction <add>, %283, %cst_126 [1] : vector<8x32xf32> to vector<8xf32>
    %285 = vector.shape_cast %284 : vector<8xf32> to vector<8x1xf32>
    %cst_127 = arith.constant 3.200000e+01 : f32
    %286 = vector.broadcast %cst_127 : f32 to vector<8x1xf32>
    %287 = arith.divf %285, %286 : vector<8x1xf32>
    %288 = vector.broadcast %280 : vector<8x1xf32> to vector<8x32xf32>
    %289 = arith.subf %274, %288 : vector<8x32xf32>
    %cst_128 = arith.constant 9.99999974E-6 : f32
    %290 = vector.broadcast %cst_128 : f32 to vector<8x1xf32>
    %291 = arith.addf %287, %290 : vector<8x1xf32>
    %292 = math.rsqrt %291 : vector<8x1xf32>
    %293 = vector.broadcast %292 : vector<8x1xf32> to vector<8x32xf32>
    %294 = arith.mulf %289, %293 : vector<8x32xf32>
    %295 = vector.broadcast %275 : vector<1x32xf32> to vector<8x32xf32>
    %296 = arith.mulf %294, %295 : vector<8x32xf32>
    %297 = vector.broadcast %276 : vector<1x32xf32> to vector<8x32xf32>
    %298 = arith.addf %296, %297 : vector<8x32xf32>
    %299 = vector.shape_cast %298 : vector<8x32xf32> to vector<1x8x32xf32>
    %c0_129 = arith.constant 0 : index
    %c0_130 = arith.constant 0 : index
    %c0_131 = arith.constant 0 : index
    %300 = vector.load %arg20[%c0_129, %c0_130, %c0_131] : memref<1x8x32xf32, #tpu.memory_space<vmem>>, vector<1x8x32xf32>
    tpu.vector_store %arg20[%c0_129, %c0_130, %c0_131], %299 {strides = array<i32>} : memref<1x8x32xf32, #tpu.memory_space<vmem>>, vector<1x8x32xf32>,
    return
  }
  func.func @transform_0(%arg0: i32) -> i32 {
    %c0_i32 = arith.constant 0 : i32
    %c0_i32_0 = arith.constant 0 : i32
    return %c0_i32 : i32
  }
  func.func @transform_1(%arg0: i32) -> (i32, i32, i32) {
    %c0_i32 = arith.constant 0 : i32
    %c0_i32_0 = arith.constant 0 : i32
    %c0_i32_1 = arith.constant 0 : i32
    return %arg0, %c0_i32, %c0_i32_0 : i32, i32, i32
  }
  func.func @transform_2(%arg0: i32) -> (i32, i32) {
    %c0_i32 = arith.constant 0 : i32
    %c0_i32_0 = arith.constant 0 : i32
    %c0_i32_1 = arith.constant 0 : i32
    return %c0_i32, %c0_i32_0 : i32, i32
  }
  func.func @transform_3(%arg0: i32) -> (i32, i32) {
    %c0_i32 = arith.constant 0 : i32
    %c0_i32_0 = arith.constant 0 : i32
    %c0_i32_1 = arith.constant 0 : i32
    return %c0_i32, %c0_i32_0 : i32, i32
  }
  func.func @transform_4(%arg0: i32) -> (i32, i32) {
    %c0_i32 = arith.constant 0 : i32
    %c0_i32_0 = arith.constant 0 : i32
    %c0_i32_1 = arith.constant 0 : i32
    return %c0_i32, %c0_i32_0 : i32, i32
  }
  func.func @transform_5(%arg0: i32) -> (i32, i32) {
    %c0_i32 = arith.constant 0 : i32
    %c0_i32_0 = arith.constant 0 : i32
    %c0_i32_1 = arith.constant 0 : i32
    return %c0_i32, %c0_i32_0 : i32, i32
  }
  func.func @transform_6(%arg0: i32) -> (i32, i32) {
    %c0_i32 = arith.constant 0 : i32
    %c0_i32_0 = arith.constant 0 : i32
    %c0_i32_1 = arith.constant 0 : i32
    return %c0_i32, %c0_i32_0 : i32, i32
  }
  func.func @transform_7(%arg0: i32) -> (i32, i32) {
    %c0_i32 = arith.constant 0 : i32
    %c0_i32_0 = arith.constant 0 : i32
    %c0_i32_1 = arith.constant 0 : i32
    return %c0_i32, %c0_i32_0 : i32, i32
  }
  func.func @transform_8(%arg0: i32) -> (i32, i32) {
    %c0_i32 = arith.constant 0 : i32
    %c0_i32_0 = arith.constant 0 : i32
    %c0_i32_1 = arith.constant 0 : i32
    return %c0_i32, %c0_i32_0 : i32, i32
  }
  func.func @transform_9(%arg0: i32) -> (i32, i32) {
    %c0_i32 = arith.constant 0 : i32
    %c0_i32_0 = arith.constant 0 : i32
    %c0_i32_1 = arith.constant 0 : i32
    return %c0_i32, %c0_i32_0 : i32, i32
  }
  func.func @transform_10(%arg0: i32) -> (i32, i32) {
    %c0_i32 = arith.constant 0 : i32
    %c0_i32_0 = arith.constant 0 : i32
    %c0_i32_1 = arith.constant 0 : i32
    return %c0_i32, %c0_i32_0 : i32, i32
  }
  func.func @transform_11(%arg0: i32) -> (i32, i32) {
    %c0_i32 = arith.constant 0 : i32
    %c0_i32_0 = arith.constant 0 : i32
    %c0_i32_1 = arith.constant 0 : i32
    return %c0_i32, %c0_i32_0 : i32, i32
  }
  func.func @transform_12(%arg0: i32) -> (i32, i32) {
    %c0_i32 = arith.constant 0 : i32
    %c0_i32_0 = arith.constant 0 : i32
    %c0_i32_1 = arith.constant 0 : i32
    return %c0_i32, %c0_i32_0 : i32, i32
  }
  func.func @transform_13(%arg0: i32) -> (i32, i32) {
    %c0_i32 = arith.constant 0 : i32
    %c0_i32_0 = arith.constant 0 : i32
    %c0_i32_1 = arith.constant 0 : i32
    return %c0_i32, %c0_i32_0 : i32, i32
  }
  func.func @transform_14(%arg0: i32) -> (i32, i32) {
    %c0_i32 = arith.constant 0 : i32
    %c0_i32_0 = arith.constant 0 : i32
    %c0_i32_1 = arith.constant 0 : i32
    return %c0_i32, %c0_i32_0 : i32, i32
  }
  func.func @transform_15(%arg0: i32) -> (i32, i32) {
    %c0_i32 = arith.constant 0 : i32
    %c0_i32_0 = arith.constant 0 : i32
    %c0_i32_1 = arith.constant 0 : i32
    return %c0_i32, %c0_i32_0 : i32, i32
  }
  func.func @transform_16(%arg0: i32) -> (i32, i32) {
    %c0_i32 = arith.constant 0 : i32
    %c0_i32_0 = arith.constant 0 : i32
    %c0_i32_1 = arith.constant 0 : i32
    return %c0_i32, %c0_i32_0 : i32, i32
  }
  func.func @transform_17(%arg0: i32) -> (i32, i32) {
    %c0_i32 = arith.constant 0 : i32
    %c0_i32_0 = arith.constant 0 : i32
    %c0_i32_1 = arith.constant 0 : i32
    return %c0_i32, %c0_i32_0 : i32, i32
  }
  func.func @transform_18(%arg0: i32) -> (i32, i32) {
    %c0_i32 = arith.constant 0 : i32
    %c0_i32_0 = arith.constant 0 : i32
    %c0_i32_1 = arith.constant 0 : i32
    return %c0_i32, %c0_i32_0 : i32, i32
  }
  func.func @transform_19(%arg0: i32) -> (i32, i32, i32) {
    %c0_i32 = arith.constant 0 : i32
    %c0_i32_0 = arith.constant 0 : i32
    %c0_i32_1 = arith.constant 0 : i32
    return %arg0, %c0_i32, %c0_i32_0 : i32, i32, i32
  }
}

</mosaic_0001>

<bundles_post_ra>
// kernel: tpu_custom_call.1
= control target key start
LH: loop header
LB: loop body
LE: loop exit
PB: predicated region body
PF: predicated region fallthrough
CT: control target
= control target key end

     0   :  { %s3156_s0 = inlined_call_operand.<no memory space> [shape: f32[1], index: 0, kind: input, shape index: {}]   ;;  %s3157_s1 = inlined_call_operand.hbm [shape: f32[2,8,32], index: 1, kind: input, shape index: {}]   ;;  %s3158_s2 = inlined_call_operand.vmem [shape: f32[32,32], index: 2, kind: input, shape index: {}]   ;;  %s3159_s3 = inlined_call_operand.vmem [shape: f32[1,32], index: 3, kind: input, shape index: {}]   ;;  %s3160_s4 = inlined_call_operand.vmem [shape: f32[32,32], index: 4, kind: input, shape index: {}]   ;;  %s3161_s5 = inlined_call_operand.vmem [shape: f32[1,32], index: 5, kind: input, shape index: {}]   ;;  %s3162_s6 = inlined_call_operand.hbm [shape: f32[32,32], index: 6, kind: input, shape index: {}]   ;;  %s3163_s7 = inlined_call_operand.vmem [shape: f32[1,32], index: 7, kind: input, shape index: {}]   ;;  %s3164_s8 = inlined_call_operand.hbm [shape: f32[32,32], index: 8, kind: input, shape index: {}]   ;;  %s3165_s9 = inlined_call_operand.vmem [shape: f32[1,32], index: 9, kind: input, shape index: {}]   ;;  %s3166_s10 = inlined_call_operand.vmem [shape: f32[1,32], index: 10, kind: input, shape index: {}]   ;;  %s3167_s11 = inlined_call_operand.vmem [shape: f32[1,32], index: 11, kind: input, shape index: {}]   ;;  %s3168_s12 = inlined_call_operand.vmem [shape: f32[32,8], index: 12, kind: input, shape index: {}]   ;;  %s3169_s13 = inlined_call_operand.vmem [shape: f32[1,8], index: 13, kind: input, shape index: {}]   ;;  %s3170_s14 = inlined_call_operand.vmem [shape: f32[32,16], index: 14, kind: input, shape index: {}]   ;;  %s3171_s15 = inlined_call_operand.vmem [shape: f32[1,16], index: 15, kind: input, shape index: {}]   ;;  %s3172_s16 = inlined_call_operand.vmem [shape: f32[1,8], index: 16, kind: input, shape index: {}]   ;;  %s3173_s17 = inlined_call_operand.vmem [shape: f32[1,32], index: 17, kind: input, shape index: {}]   ;;  %s3174_s18 = inlined_call_operand.vmem [shape: f32[1,32], index: 18, kind: input, shape index: {}]   ;;  %s3175_s19 = inlined_call_operand.hbm [shape: f32[2,8,32], index: 19, kind: output, shape index: {}]  }
   0x1   :  { %3186 = sst [smem:[#allocation20_spill]] %s3156_s0 }
   0x2   :  { %3187 = sst [smem:[#allocation21_spill]] %s3157_s1 }
   0x3   :  { %3188 = sst [smem:[#allocation22_spill]] %s3158_s2 }
   0x4   :  { %3189 = sst [smem:[#allocation23_spill]] %s3159_s3 }
   0x5   :  { %3190 = sst [smem:[#allocation24_spill]] %s3160_s4 }
   0x6   :  { %3191 = sst [smem:[#allocation25_spill]] %s3162_s6 }
   0x7   :  { %3192 = sst [smem:[#allocation26_spill]] %s3164_s8 }
   0x8   :  { %3193 = sst [smem:[#allocation27_spill]] %s3173_s17 }
   0x9   :  { %3194 = sst [smem:[#allocation28_spill]] %s3174_s18 }
   0xa   :  { %3195 = sst [smem:[#allocation29_spill]] %s3175_s19 }
   0xb   :  { %s3196_s20 = sld [smem:[#allocation20_spill]] }
  0x11   :  { %24 = sst [smem:[#allocation3]] %s3196_s20 }
  0x12   :  { %25 = vsyncpa [#allocation5], 0 }
  0x13   :  { %27 = vsyncpa [#allocation5 + $0x1], 0 }
  0x14   :  { %28 = vsyncpa [#allocation8], 0 }
  0x15   :  { %29 = vsyncpa [#allocation6], 0 }
  0x16   :  { %31 = vsyncpa [#allocation6 + $0x1], 0  ;;  %s2554_s21 = smov 0   ;;  %s2556_s1 = smov 0  }
  0x17   :  { %s2558_s22 = smov 0   ;;  %s2560_s2 = smov 0  }
  0x18 LB: > { %3197 = sst [smem:[#allocation14_spill]] %s2410_s21  ;;  %s2578_s3 = sadd.s32 4294967295, %s2422_s2   ;;  %s2422_s2 = sphi %s2560_s2, %s3226_s2   ;;  %s2418_s22 = sphi %s2558_s22, %s3228_s22   ;;  %s2414_s1 = sphi %s2556_s1, %s3230_s1   ;;  %s2410_s21 = sphi %s2554_s21, %s3229_s21  }
  0x19   : > { %3198 = sst [smem:[#allocation15_spill]] %s2418_s22  ;;  %p2066_p0 = scmp.ge.s32.totalorder %s2422_s2, 1 }
  0x1a   : > { %s3199_s6 = sld [smem:[#allocation25_spill]]  ;;  %p79_p1 = scmp.eq.s32.totalorder %s2578_s3, 0 }
  0x1b   : > { %p472_p2 = scmp.lt.s32.totalorder %s2422_s2, 3  ;;  %s2424_s27 = smov [#allocation7]  }
  0x1c   : > { %s500_s28 = sshll.u32 %s2424_s27, 4  ;;  %s3201_s8 = sld [smem:[#allocation26_spill]]  ;;  %s501_s28 = int_to_ptr.vmem [resolvable:$true] %s500_s28 }
  0x1d   : > { %p2583_p3 = pnand %p2066_p0, %p472_p2  ;;  %s2425_s20 = smov [#allocation9]  }
  0x1e   : > { %s517_s23 = sshll.u32 %s2425_s20, 4  ;;  %s2426_s24 = smov 128   ;;  %s518_s23 = int_to_ptr.vmem [resolvable:$true] %s517_s23 }
  0x1f   : > { %p2129_p4 = pneg %p2583_p3  ;;  %s2427_s27 = smov 8  }
  0x20   : > { %s498_s25 = sshll.u32 %s3199_s6, 4  ;;  %s2065_s29 = sadd.s32 4294967294, %s2422_s2   ;;  %s499_s25 = int_to_ptr.hbm [resolvable:$true] %s498_s25 }
  0x21   : > { %p2130_p6 = pnand %p2129_p4, %p79_p1  ;;  %s2597_s0 = sadd.s32 1, %s2422_s2  }
  0x22   : > { %s515_s30 = sshll.u32 %s3201_s8, 4  ;;  %3202 = sst [smem:[#allocation16_spill]] %s2597_s0  ;;  %s516_s30 = int_to_ptr.hbm [resolvable:$true] %s515_s30 }
  0x23   : > { %2132 = dma.hbm_to_vmem [thread:$0]  (!%p2130_p6), %s499_s25, 512, %s501_s28, [#allocation8], %s2426_s24, %s2426_s24, %s2427_s27  }
  0x24   : > { %2135 = dma.hbm_to_vmem [thread:$0]  (!%p2130_p6), %s516_s30, 512, %s518_s23, [#allocation8], %s2426_s24, %s2426_s24, %s2427_s27  }
  0x25   : > { %s62_s6 = ssub.s32 %s2422_s2, %s2597_s0  ;;  %s65_s8 = sadd.s32 1, %s2418_s22 }
  0x26   : > { %p63_p7 = scmp.eq.s32.totalorder %s62_s6, 0  ;;  %p72_p8 = scmp.ne.s32.totalorder %s2418_s22, %s2414_s1 }
  0x27   : > { %p73_p9 = scmp.eq.s32.totalorder %s2422_s2, 0  ;;  %p78_p10 = scmp.ne.s32.totalorder %s2414_s1, %s2410_s21 }
  0x28   : > { %s2608_s20 = scalar_select %p63_p7, %s2418_s22, %s65_s8  }
  0x29   : > { %p2610_p11 = por %p73_p9, %p72_p8  ;;  %p2616_p12 = por %p79_p1, %p78_p10 }
  0x2a   : > { %3203 = sst [smem:[#allocation17_spill]] %s2608_s20  ;;  %p459_p13 = scmp.eq.s32.totalorder %s2578_s3, 1 }
  0x2b   : > { %p465_p0 = scmp.eq.s32.totalorder %s2065_s29, 1  ;;  %p2146_p2 = scmp.lt.s32.totalorder %s2422_s2, 2 }
  0x2c   : > { %s561_s28 = sand.u32 1, %s2418_s22   ;;  %p2623_p4 = por %p459_p13, %p72_p8 }
  0x2d   : > { %p2627_p6 = por %p465_p0, %p78_p10  ;;  %s2070_s30 = sshll.u32 %s561_s28, 3 }
  0x2e   : > { %s3206_s6 = scalar_select %p2623_p4, 1, 0 }
  0x2f   : > { %s3208_s8 = scalar_select %p2627_p6, 1, 0 }
  0x30   : > { %3207 = sst [smem:[#allocation18_spill]] %s3206_s6  ;;  %s2071_s23 = sshll.u32 %s2422_s2, 3 }
  0x31   : > { %3209 = sst [smem:[#allocation19_spill]] %s3208_s8  ;;  %s565_s21 = scalar_lea.vmem [#allocation4], %s2070_s30 }
  0x32   : > { %s3210_s20 = sld [smem:[#allocation21_spill]]  ;;  %s573_s19 = sshll.u32 %s565_s21, 4  ;;  %s574_s19 = int_to_ptr.vmem [resolvable:$true] %s573_s19 }
  0x33   : > { %p2637_p7 = pnand %p2146_p2, %p2610_p11  ;;  %s562_s22 = scalar_lea.sflag [#allocation5], %s561_s28 }
  0x35   : > { %p2326_p9 = pneg %p2637_p7 }
  0x38   : > { %s569_s0 = scalar_lea.hbm %s3210_s20, %s2071_s23 }
  0x39   : > { %s571_s17 = sshll.u32 %s569_s0, 4  ;;  %s2329_s0 = scalar_lea.hbm %s3210_s20, 16  ;;  %s572_s17 = int_to_ptr.hbm [resolvable:$true] %s571_s17 }
  0x3a   : > { %s2322_s6 = sshra.s32 %s572_s17, 4  ;;  %s2323_s6 = int_to_ptr.hbm [resolvable:$true] %s2322_s6 }
  0x3b   : > { %s2324_s8 = scalar_lea.hbm %s2323_s6, 8  ;;  %p2330_p11 = scmp.lt.s32.totalorder %s2323_s6, %s3210_s20 }
  0x3c   : > { %p2325_p8 = scmp.ne.s32.totalorder %s2323_s6, %s2324_s8  ;;  %p2331_p0 = scmp.lt.s32.totalorder %s2329_s0, %s2324_s8 }
  0x3e   : > { %p2327_p10 = pnand %p2326_p9, %p2325_p8  ;;  %p2332_p2 = por %p2331_p0, %p2330_p11 }
  0x40   : > { %p2328_p13 = pneg %p2327_p10 }
  0x42   : > { %p2333_p5 = pnand %p2332_p2, %p2328_p13 }
  0x44   : > { %2336 = shalt.err (!%p2333_p5)
}
  0x45   : > { %2139 = dma.hbm_to_vmem [thread:$0]  (!%p2637_p7), %s572_s17, 128, %s574_s19, %s562_s22  }
  0x46   : > { %582 = sbr.rel (%p2583_p3) target bundleno = 2059 (0x80b), region = 96  ;;  %s2654_s28 = sand.u32 (!%p2583_p3), 1, %s2414_s1  }
  0x47   : > { %s2073_s24 = sshll.u32 (!%p2583_p3), %s2654_s28, 3  ;;  %s585_s27 = scalar_lea.sflag (!%p2583_p3), [#allocation5], %s2654_s28 }
  0x48   : > { %s588_s6 = scalar_lea.vmem (!%p2583_p3), [#allocation4], %s2073_s24 }
  0x4b   : > { %2397 = dma.done.wait (%p2616_p12), %s585_s27, 128  }
  0x4c   : > { %2399 = vsyncadd (%p2616_p12), %s585_s27, 4294967168 }
  0x4d   : > { %2401 = dma.done.wait (%p79_p1), [#allocation8], 1024  }
  0x4e   : > { %2403 = vsyncadd (%p79_p1), [#allocation8], 4294966272  ;;  %s3212_s4 = sld [smem:[#allocation24_spill]]  ;;  %v2689_v7 = vld [vmem:[%s588_s6] sm:$0xff]  ;;  %vm663_vm0 = vcmask 261120   ;;  %vm743_vm1 = vcmask 31744  }
  0x4f   : > { %s3213_s30 = sld [smem:[#allocation22_spill]]  ;;  %v2209_v9 = vld [vmem:[%s3161_s5] ss:$0 sm:$0xff]  ;;  %s2428_s0 = smov 112   ;;  %v718_v15 = vld [vmem:[#allocation7 + $0x18] sm:$0xff]  ;;  %v717_v16 = vld [vmem:[#allocation7 + $0x10] sm:$0xff] }
  0x50   : > { %s3214_s21 = sld [smem:[#allocation23_spill]]  ;;  %s2429_s23 = smov 124   ;;  %735 = vmatpush.msra.mxu2 %v718_v15  ;;  %v716_v17 = vld [vmem:[#allocation7 + $0x8] sm:$0xff]  ;;  %v715_v18 = vld [vmem:[#allocation7] sm:$0xff]  ;;  %vm771_vm2 = vcmask 64512  }
  0x51   : > { %s2430_s18 = smov 120   ;;  %s2431_s27 = smov 104   ;;  %v2211_v32 = vld [vmem:[%s3163_s7] ss:$0 sm:$0xff] }
  0x52   : > { %736 = vmatpush.msra.mxu2 %v717_v16  ;;  %s2432_s17 = smov 116   ;;  %s2433_s19 = smov 108  }
  0x53   : > { %s2434_s22 = smov 100   ;;  %s2435_s29 = smov 4  }
  0x54   : > { %v690_v0 = vld [vmem:[%s3212_s4 + $0x18] sm:$0xff]  ;;  %v689_v1 = vld [vmem:[%s3212_s4 + $0x10] sm:$0xff]  ;;  %v688_v4 = vld [vmem:[%s3212_s4 + $0x8] sm:$0xff]  ;;  %737 = vmatpush.msra.mxu2 %v716_v17  ;;  %s2436_s6 = smov 12   ;;  %s2437_s25 = smov 8  }
  0x55   : > { %v658_v2 = vld [vmem:[%s3213_s30 + $0x18] sm:$0xff]  ;;  %707 = vmatpush.msra.mxu1 %v690_v0  ;;  %v657_v3 = vld [vmem:[%s3213_s30 + $0x10] sm:$0xff]  ;;  %v687_v5 = vld [vmem:[%s3212_s4] sm:$0xff] }
  0x56   : > { %679 = vmatpush.msra.mxu0 %v658_v2  ;;  %v656_v6 = vld [vmem:[%s3213_s30 + $0x8] sm:$0xff]  ;;  %v655_v8 = vld [vmem:[%s3213_s30] sm:$0xff]  ;;  %738 = vmatpush.msra.mxu2 %v715_v18 }
  0x57   : > { %708 = vmatpush.msra.mxu1 %v689_v1  ;;  %v2210_v10 = vld [vmem:[%s3214_s21] ss:$0 sm:$0xff]  ;;  %2079 = vmatmul.msk.f32.vlgmr.msra.gmra.mxu2 %vm663_vm0, %v2689_v7  ;;  %s2438_s21 = smov 20  }
  0x58   : > { %680 = vmatpush.msra.mxu0 %v657_v3 }
  0x59   : > { %709 = vmatpush.msra.mxu1 %v688_v4 }
  0x5a   : > { %681 = vmatpush.msra.mxu0 %v656_v6 }
  0x5b   : > { %710 = vmatpush.msra.mxu1 %v687_v5 }
  0x5c   : > { %682 = vmatpush.msra.mxu0 %v655_v8  ;;  %2078 = vmatmul.msk.f32.vlgmr.msra.gmra.mxu1 %vm663_vm0, %v2689_v7 }
  0x5d   : > { %2077 = vmatmul.msk.f32.vlgmr.msra.gmra.mxu0 %vm663_vm0, %v2689_v7 }
  0xd9   : > { %v712_v11 = vpop.f32.mrf.mxu1 }
  0xda   : > { %v684_v12 = vpop.f32.mrf.mxu0  ;;  %v713_v13 = vadd.f32 %v2209_v9, %v712_v11  ;;  %v740_v34 = vpop.f32.mrf.mxu2 }
  0xdb   : > { %v685_v14 = vadd.f32 %v2210_v10, %v684_v12  ;;  %v2737_v36 = vadd.f32 %v2211_v32, %v740_v34 }
  0xdc   : > { %1078 = vrot.lane.b32.xlu2 %v713_v13, %s2428_s0  ;;  %822 = vrot.lane.b32.xlu1 %v713_v13, %s2429_s23 }
  0xdd   : > { %908 = vrot.lane.b32.xlu0 %v713_v13, %s2430_s18  ;;  %2080 = vmatpush.xpose.msk.msra.mxu3 %vm743_vm1, %v713_v13 }
  0xe0   : > { %2081 = vmatmul.msk.f32.vlgmr.msra.gmra.mxu3 %vm743_vm1, %v685_v14 }
  0xe1   : > { %814 = vmatpush.msrb.mxu3 %v2737_v36 }
  0xe4   : > { %1076 = vrot.lane.b32.xlu2 %v685_v14, %s2428_s0  ;;  %820 = vrot.lane.b32.xlu1 %v685_v14, %s2429_s23 }
  0xe5   : > { %906 = vrot.lane.b32.xlu0 %v685_v14, %s2430_s18 }
  0xec   : > { %1248 = vrot.lane.b32.xlu2 %v713_v13, %s2431_s27  ;;  %991 = vrot.lane.b32.xlu1 %v685_v14, %s2432_s17 }
  0xed   : > { %993 = vrot.lane.b32.xlu0 %v713_v13, %s2432_s17 }
  0xf4   : > { %1161 = vrot.lane.b32.xlu2 %v685_v14, %s2433_s19  ;;  %1163 = vrot.lane.b32.xlu1 %v713_v13, %s2433_s19 }
  0xf5   : > { %1246 = vrot.lane.b32.xlu0 %v685_v14, %s2431_s27 }
  0xfc   : > { %1331 = vrot.lane.b32.xlu1 %v685_v14, %s2434_s22 }
  0xfd   : > { %1333 = vrot.lane.b32.xlu0 %v713_v13, %s2434_s22 }
 0x104   : > { %874 = vrot.lane.b32.xlu1 %v2737_v36, %s2429_s23  ;;  %s2440_s23 = smov 24  }
 0x136   : > { %v1079_v19 = vpop.permute.xlu2 %1078 }
 0x13e   : > { %v1077_v20 = vpop.permute.xlu2 %1076 }
 0x146   : > { %v1249_v25 = vpop.permute.xlu2 %1248 }
 0x14e   : > { %v823_v21 = vpop.permute.xlu1 %822  ;;  %v1162_v35 = vpop.permute.xlu2 %1161 }
 0x14f   : > { %v909_v22 = vpop.permute.xlu0 %908  ;;  %2083 = vmatpush.xpose.msk.msrb.mxu0 %vm743_vm1, %v823_v21 }
 0x150   : > { %2086 = vmatpush.xpose.msk.msrb.mxu2 %vm743_vm1, %v909_v22 }
 0x154   : > { %2092 = vmatpush.xpose.msk.msra.mxu2 %vm743_vm1, %v1079_v19 }
 0x156   : > { %v821_v23 = vpop.permute.xlu1 %820 }
 0x157   : > { %v907_v24 = vpop.permute.xlu0 %906  ;;  %2084 = vmatmul.msk.f32.vlgmr.msrb.gmra.mxu0 %vm743_vm1, %v821_v23 }
 0x158   : > { %2087 = vmatmul.msk.f32.vlgmr.msrb.gmra.mxu2 %vm743_vm1, %v907_v24 }
 0x159   : > { %2098 = vmatpush.xpose.msk.msrb.mxu2 %vm743_vm1, %v1249_v25 }
 0x15e   : > { %v992_v26 = vpop.permute.xlu1 %991 }
 0x15f   : > { %v994_v27 = vpop.permute.xlu0 %993 }
 0x160   : > { %2089 = vmatpush.xpose.msk.msra.mxu0 %vm743_vm1, %v994_v27  ;;  %2093 = vmatmul.msk.f32.vlgmr.msra.gmra.mxu2 %vm743_vm1, %v1077_v20 }
 0x163   : > { %v767_v28 = vpop.f32.mrf.mxu3  ;;  %2090 = vmatmul.msk.f32.vlgmr.msra.gmra.mxu0 %vm743_vm1, %v992_v26 }
 0x164   : > { %v770_v29 = vmul.f32 0.5, %v767_v28 }
 0x166   : > { %v1164_v30 = vpop.permute.xlu1 %1163  ;;  %v772_v31 = vsel %vm771_vm2, %v770_v29, -inf }
 0x167   : > { %v1247_v33 = vpop.permute.xlu0 %1246  ;;  %773 = vmax.xlane.f32.xlu2 %v772_v31  ;;  %2095 = vmatpush.xpose.msk.msrb.mxu0 %vm743_vm1, %v1164_v30 }
 0x168   : > { %2099 = vmatmul.msk.f32.vlgmr.msrb.gmra.mxu2 %vm743_vm1, %v1247_v33 }
 0x16b   : > { %2096 = vmatmul.msk.f32.vlgmr.msrb.gmra.mxu0 %vm743_vm1, %v1162_v35 }
 0x16e   : > { %v1332_v38 = vpop.permute.xlu1 %1331 }
 0x16f   : > { %v1334_v37 = vpop.permute.xlu0 %1333 }
 0x170   : > { %2101 = vmatpush.xpose.msk.msra.mxu0 %vm743_vm1, %v1334_v37 }
 0x173   : > { %2102 = vmatmul.msk.f32.vlgmr.msra.gmra.mxu0 %vm743_vm1, %v1332_v38 }
 0x176   : > { %v875_v59 = vpop.permute.xlu1 %874 }
 0x177   : > { %895 = vmatpush.msrb.mxu1 %v875_v59 }
 0x1d4   : > { %v845_v39 = vpop.f32.mrf.mxu0 }
 0x1d5   : > { %v848_v40 = vmul.f32 0.5, %v845_v39 }
 0x1d7   : > { %v849_v41 = vsel %vm771_vm2, %v848_v40, -inf }
 0x1d8   : > { %850 = vmax.xlane.f32.xlu0 %v849_v41 }
 0x1da   : > { %v774_v45 = vpop.xlane.xlu2 %773 }
 0x1db   : > { %v931_v42 = vpop.f32.mrf.mxu2  ;;  %v775_v48 = vsub.f32 %v770_v29, %v774_v45 }
 0x1dc   : > { %v934_v43 = vmul.f32 0.5, %v931_v42 }
 0x1dd   : > { %v776_v51 = vmul.f32 1.442695, %v775_v48 }
 0x1de   : > { %v935_v44 = vsel %vm771_vm2, %v934_v43, -inf }
 0x1df   : > { %936 = vmax.xlane.f32.xlu1 %v935_v44  ;;  %2220 = vpow2.f32 %v776_v51 }
 0x1e0   : > { %v1016_v46 = vpop.f32.mrf.mxu0 }
 0x1e1   : > { %v1019_v47 = vmul.f32 0.5, %v1016_v46 }
 0x1e3   : > { %v1101_v49 = vpop.f32.mrf.mxu2  ;;  %v1020_v50 = vsel %vm771_vm2, %v1019_v47, -inf }
 0x1e4   : > { %1021 = vmax.xlane.f32.xlu2 %v1020_v50  ;;  %v1104_v52 = vmul.f32 0.5, %v1101_v49 }
 0x1e5   : > { %v2751_v61 = vpop.eup %2220 }
 0x1e6   : > { %v1105_v57 = vsel %vm771_vm2, %v1104_v52, -inf  ;;  %v778_v1 = vsel %vm771_vm2, %v2751_v61, 0.0 }
 0x1e8   : > { %v1186_v53 = vpop.f32.mrf.mxu0 }
 0x1e9   : > { %v1189_v54 = vmul.f32 0.5, %v1186_v53 }
 0x1eb   : > { %v1271_v55 = vpop.f32.mrf.mxu2  ;;  %v1190_v56 = vsel %vm771_vm2, %v1189_v54, -inf }
 0x1ec   : > { %v1274_v58 = vmul.f32 0.5, %v1271_v55  ;;  %1191 = vmax.xlane.f32.xlu0 %v1190_v56  ;;  %1106 = vmax.xlane.f32.xlu2 %v1105_v57 }
 0x1ee   : > { %v1275_v60 = vsel %vm771_vm2, %v1274_v58, -inf }
 0x1ef   : > { %1276 = vmax.xlane.f32.xlu1 %v1275_v60 }
 0x1f0   : > { %v1356_v62 = vpop.f32.mrf.mxu0 }
 0x1f1   : > { %v1359_v63 = vmul.f32 0.5, %v1356_v62 }
 0x1f3   : > { %v1360_v0 = vsel %vm771_vm2, %v1359_v63, -inf }
 0x1f4   : > { %1361 = vmax.xlane.f32.xlu2 %v1360_v0  ;;  %779 = vadd.xlane.f32.xlu0 %v778_v1 }
 0x208   : > { %1129 = vrot.lane.b32.xlu1 %v2737_v36, %s2428_s0  ;;  %1044 = vrot.lane.b32.xlu0 %v2737_v36, %s2432_s17  ;;  %s2439_s0 = smov 16  }
 0x20c   : > { %959 = vrot.lane.b32.xlu2 %v2737_v36, %s2430_s18  ;;  %s2441_s18 = smov 28  }
 0x24b   : > { %v851_v2 = vpop.xlane.xlu0 %850 }
 0x24c   : > { %v852_v3 = vsub.f32 %v848_v40, %v851_v2 }
 0x24e   : > { %v853_v4 = vmul.f32 1.442695, %v852_v3 }
 0x250   : > { %2222 = vpow2.f32 %v853_v4 }
 0x252   : > { %v937_v5 = vpop.xlane.xlu1 %936 }
 0x253   : > { %v938_v6 = vsub.f32 %v934_v43, %v937_v5 }
 0x255   : > { %v939_v8 = vmul.f32 1.442695, %v938_v6 }
 0x256   : > { %v2762_v9 = vpop.eup %2222 }
 0x257   : > { %2224 = vpow2.f32 %v939_v8  ;;  %v1022_v10 = vpop.xlane.xlu2 %1021  ;;  %v855_v11 = vsel %vm771_vm2, %v2762_v9, 0.0 }
 0x258   : > { %v1023_v12 = vsub.f32 %v1019_v47, %v1022_v10  ;;  %856 = vadd.xlane.f32.xlu1 %v855_v11 }
 0x25a   : > { %v1024_v13 = vmul.f32 1.442695, %v1023_v12 }
 0x25c   : > { %2226 = vpow2.f32 %v1024_v13 }
 0x25d   : > { %v2766_v14 = vpop.eup %2224 }
 0x25e   : > { %v941_v15 = vsel %vm771_vm2, %v2766_v14, 0.0 }
 0x25f   : > { %v1192_v16 = vpop.xlane.xlu0 %1191  ;;  %942 = vadd.xlane.f32.xlu2 %v941_v15  ;;  %v1107_v17 = vpop.xlane.xlu2 %1106 }
 0x260   : > { %v1193_v18 = vsub.f32 %v1189_v54, %v1192_v16  ;;  %v1108_v19 = vsub.f32 %v1104_v52, %v1107_v17 }
 0x262   : > { %v2770_v20 = vpop.eup %2226  ;;  %v1194_v21 = vmul.f32 1.442695, %v1193_v18  ;;  %v1109_v22 = vmul.f32 1.442695, %v1108_v19  ;;  %v1277_v23 = vpop.xlane.xlu1 %1276 }
 0x263   : > { %v1278_v24 = vsub.f32 %v1274_v58, %v1277_v23  ;;  %v1026_v25 = vsel %vm771_vm2, %v2770_v20, 0.0 }
 0x264   : > { %2228 = vpow2.f32 %v1194_v21  ;;  %1027 = vadd.xlane.f32.xlu0 %v1026_v25 }
 0x265   : > { %2230 = vpow2.f32 %v1109_v22  ;;  %v1279_v26 = vmul.f32 1.442695, %v1278_v24 }
 0x267   : > { %2232 = vpow2.f32 %v1279_v26  ;;  %v780_v27 = vpop.xlane.xlu0 %779  ;;  %v1362_v28 = vpop.xlane.xlu2 %1361 }
 0x268   : > { %2234 = vrcp.f32 %v780_v27  ;;  %v1363_v29 = vsub.f32 %v1359_v63, %v1362_v28  ;;  %v792_v42 = vand.u32 2147483648, %v780_v27  ;;  %v790_v45 = vand.u32 2147483647, %v780_v27 }
 0x269   : > { %vm786_vm4 = vweird.f32 %v780_v27 }
 0x26a   : > { %v2774_v30 = vpop.eup %2228  ;;  %v1364_v32 = vmul.f32 1.442695, %v1363_v29  ;;  %v793_v47 = vor.u32 1.1754944e-38, %v792_v42  ;;  %vm791_vm6 = vcmp.eq.f32.partialorder %v790_v45, 8.507059e+37 }
 0x26b   : > { %v2776_v31 = vpop.eup %2230  ;;  %v1196_v33 = vsel %vm771_vm2, %v2774_v30, 0.0 }
 0x26c   : > { %1197 = vadd.xlane.f32.xlu2 %v1196_v33  ;;  %v1111_v34 = vsel %vm771_vm2, %v2776_v31, 0.0  ;;  %2236 = vpow2.f32 %v1364_v32 }
 0x26d   : > { %v2782_v35 = vpop.eup %2232  ;;  %1112 = vadd.xlane.f32.xlu1 %v1111_v34 }
 0x26e   : > { %v2235_v37 = vpop.eup %2234  ;;  %v1281_v38 = vsel %vm771_vm2, %v2782_v35, 0.0 }
 0x26f   : > { %v782_v39 = vmul.f32 %v2235_v37, %v780_v27  ;;  %1282 = vadd.xlane.f32.xlu0 %v1281_v38  ;;  %v960_v40 = vpop.permute.xlu2 %959  ;;  %vm787_vm3 = vweird.f32 %v2235_v37 }
 0x270   : > { %980 = vmatpush.msra.mxu3 %v960_v40  ;;  %vm788_vm5 = vmor %vm786_vm4, %vm787_vm3 }
 0x271   : > { %v783_v41 = vsub.f32 1.0, %v782_v39 }
 0x272   : > { %v2786_v43 = vpop.eup %2236 }
 0x273   : > { %v784_v44 = vmul.f32 %v2235_v37, %v783_v41  ;;  %v1366_v48 = vsel %vm771_vm2, %v2786_v43, 0.0 }
 0x275   : > { %v785_v46 = vadd.f32 %v2235_v37, %v784_v44 }
 0x277   : > { %1367 = vadd.xlane.f32.xlu0 %v1366_v48  ;;  %v789_v49 = vsel %vm788_vm5, %v2235_v37, %v785_v46 }
 0x278   : > { %v794_v50 = vsel %vm791_vm6, %v793_v47, %v789_v49 }
 0x279   : > { %v795_v51 = vmul.f32 %v2751_v61, %v794_v50 }
 0x27a   : > { %v1130_v52 = vpop.permute.xlu1 %1129  ;;  %v1045_v53 = vpop.permute.xlu0 %1044 }
 0x27b   : > { %2082 = vmatmul.msk.f32.vlgmr.msrb.gmra.mxu3 %vm771_vm2, %v795_v51  ;;  %1065 = vmatpush.msra.mxu1 %v1045_v53 }
 0x27c   : > { %1150 = vmatpush.msrb.mxu3 %v1130_v52 }
 0x284   : > { %1214 = vrot.lane.b32.xlu2 %v2737_v36, %s2433_s19  ;;  %s3220_s19 = sld [smem:[#allocation29_spill]] }
 0x286   : > { %1299 = vrot.lane.b32.xlu1 %v2737_v36, %s2431_s27 }
 0x28b   : > { %1384 = vrot.lane.b32.xlu0 %v2737_v36, %s2434_s22 }
 0x2cb   : > { %v857_v54 = vpop.xlane.xlu1 %856 }
 0x2cc   : > { %2238 = vrcp.f32 %v857_v54  ;;  %v869_v59 = vand.u32 2147483648, %v857_v54  ;;  %v867_v61 = vand.u32 2147483647, %v857_v54  ;;  %vm863_vm8 = vweird.f32 %v857_v54 }
 0x2ce   : > { %v870_v1 = vor.u32 1.1754944e-38, %v869_v59  ;;  %vm868_vm10 = vcmp.eq.f32.partialorder %v867_v61, 8.507059e+37 }
 0x2d2   : > { %v2239_v55 = vpop.eup %2238  ;;  %v943_v56 = vpop.xlane.xlu2 %942 }
 0x2d3   : > { %v859_v57 = vmul.f32 %v2239_v55, %v857_v54  ;;  %2240 = vrcp.f32 %v943_v56  ;;  %vm864_vm7 = vweird.f32 %v2239_v55  ;;  %v955_v5 = vand.u32 2147483648, %v943_v56 }
 0x2d4   : > { %vm865_vm9 = vmor %vm863_vm8, %vm864_vm7  ;;  %v953_v11 = vand.u32 2147483647, %v943_v56  ;;  %vm949_vm12 = vweird.f32 %v943_v56 }
 0x2d5   : > { %v860_v58 = vsub.f32 1.0, %v859_v57  ;;  %v956_v17 = vor.u32 1.1754944e-38, %v955_v5 }
 0x2d6   : > { %vm954_vm14 = vcmp.eq.f32.partialorder %v953_v11, 8.507059e+37 }
 0x2d7   : > { %v861_v60 = vmul.f32 %v2239_v55, %v860_v58  ;;  %v1028_v62 = vpop.xlane.xlu0 %1027 }
 0x2d8   : > { %2242 = vrcp.f32 %v1028_v62  ;;  %v1040_v21 = vand.u32 2147483648, %v1028_v62  ;;  %vm1034_vm3 = vweird.f32 %v1028_v62 }
 0x2d9   : > { %v2241_v63 = vpop.eup %2240  ;;  %v862_v0 = vadd.f32 %v2239_v55, %v861_v60 }
 0x2da   : > { %v945_v2 = vmul.f32 %v2241_v63, %v943_v56  ;;  %vm950_vm11 = vweird.f32 %v2241_v63  ;;  %v1041_v28 = vor.u32 1.1754944e-38, %v1040_v21 }
 0x2db   : > { %v866_v36 = vsel %vm865_vm9, %v2239_v55, %v862_v0  ;;  %vm951_vm13 = vmor %vm949_vm12, %vm950_vm11 }
 0x2dc   : > { %v946_v3 = vsub.f32 1.0, %v945_v2  ;;  %v871_v4 = vsel %vm868_vm10, %v870_v1, %v866_v36 }
 0x2dd   : > { %v872_v6 = vmul.f32 %v2762_v9, %v871_v4  ;;  %v1038_v9 = vand.u32 2147483647, %v1028_v62 }
 0x2de   : > { %v2243_v8 = vpop.eup %2242  ;;  %v947_v10 = vmul.f32 %v2241_v63, %v946_v3 }
 0x2df   : > { %v1030_v12 = vmul.f32 %v2243_v8, %v1028_v62  ;;  %v2799_v13 = vpop.xlane.xlu2 %1197  ;;  %2085 = vmatmul.msk.f32.vlgmr.msrb.gmra.mxu1 %vm771_vm2, %v872_v6  ;;  %vm1035_vm15 = vweird.f32 %v2243_v8  ;;  %vm1039_vm5 = vcmp.eq.f32.partialorder %v1038_v9, 8.507059e+37 }
 0x2e0   : > { %v948_v15 = vadd.f32 %v2241_v63, %v947_v10  ;;  %v1113_v16 = vpop.xlane.xlu1 %1112  ;;  %2244 = vrcp.f32 %v2799_v13  ;;  %vm1036_vm4 = vmor %vm1034_vm3, %vm1035_vm15  ;;  %v1208_v41 = vand.u32 2147483647, %v2799_v13  ;;  %v1210_v45 = vand.u32 2147483648, %v2799_v13 }
 0x2e1   : > { %v1031_v18 = vsub.f32 1.0, %v1030_v12  ;;  %2246 = vrcp.f32 %v1113_v16  ;;  %v1123_v44 = vand.u32 2147483647, %v1113_v16  ;;  %v1125_v48 = vand.u32 2147483648, %v1113_v16 }
 0x2e2   : > { %v952_v19 = vsel %vm951_vm13, %v2241_v63, %v948_v15  ;;  %v2803_v22 = vpop.xlane.xlu0 %1282  ;;  %vm1204_vm8 = vweird.f32 %v2799_v13  ;;  %vm1119_vm9 = vweird.f32 %v1113_v16  ;;  %v1211_v53 = vor.u32 1.1754944e-38, %v1210_v45 }
 0x2e3   : > { %v957_v23 = vsel %vm954_vm14, %v956_v17, %v952_v19  ;;  %v1032_v24 = vmul.f32 %v2243_v8, %v1031_v18  ;;  %2248 = vrcp.f32 %v2803_v22  ;;  %vm1124_vm12 = vcmp.eq.f32.partialorder %v1123_v44, 8.507059e+37 }
 0x2e4   : > { %v958_v26 = vmul.f32 %v2766_v14, %v957_v23  ;;  %v1126_v55 = vor.u32 1.1754944e-38, %v1125_v48  ;;  %vm1209_vm13 = vcmp.eq.f32.partialorder %v1208_v41, 8.507059e+37  ;;  %v1295_v62 = vand.u32 2147483648, %v2803_v22 }
 0x2e5   : > { %v1033_v25 = vadd.f32 %v2243_v8, %v1032_v24  ;;  %vm1289_vm15 = vweird.f32 %v2803_v22  ;;  %v1293_v0 = vand.u32 2147483647, %v2803_v22  ;;  %v2442_v45 = vmov 32.0  }
 0x2e6   : > { %v2245_v27 = vpop.eup %2244  ;;  %2088 = vmatmul.msk.f32.vlgmr.msra.gmra.mxu3 %vm771_vm2, %v958_v26  ;;  %v1296_v4 = vor.u32 1.1754944e-38, %v1295_v62  ;;  %v1419_v26 = vld [vmem:[#allocation9 + $0x10] sm:$0xff]  ;;  %v1519_v62 = vld [vmem:[%s3170_s14] sm:$0xff] }
 0x2e7   : > { %v2247_v29 = vpop.eup %2246  ;;  %v1037_v32 = vsel %vm1036_vm4, %v2243_v8, %v1033_v25  ;;  %v1200_v33 = vmul.f32 %v2245_v27, %v2799_v13  ;;  %v1215_v34 = vpop.permute.xlu2 %1214  ;;  %vm1205_vm6 = vweird.f32 %v2245_v27  ;;  %vm1294_vm4 = vcmp.eq.f32.partialorder %v1293_v0, 8.507059e+37  ;;  %v1420_v25 = vld [vmem:[#allocation9 + $0x18] sm:$0xff] }
 0x2e8   : > { %v1042_v37 = vsel %vm1039_vm5, %v1041_v28, %v1037_v32  ;;  %v1115_v38 = vmul.f32 %v2247_v29, %v1113_v16  ;;  %1235 = vmatpush.msrb.mxu1 %v1215_v34  ;;  %vm1120_vm7 = vweird.f32 %v2247_v29  ;;  %vm1206_vm10 = vmor %vm1204_vm8, %vm1205_vm6  ;;  %1440 = vmatpush.msra.mxu2 %v1420_v25  ;;  %v1417_v28 = vld [vmem:[#allocation9] sm:$0xff] }
 0x2e9   : > { %v2249_v39 = vpop.eup %2248  ;;  %v1201_v40 = vsub.f32 1.0, %v1200_v33  ;;  %v1043_v14 = vmul.f32 %v2770_v20, %v1042_v37  ;;  %vm1121_vm11 = vmor %vm1119_vm9, %vm1120_vm7  ;;  %vm989_vm9 = vcmask 97344  }
 0x2ea   : > { %v1116_v42 = vsub.f32 1.0, %v1115_v38  ;;  %v1285_v46 = vmul.f32 %v2249_v39, %v2803_v22  ;;  %v1368_v47 = vpop.xlane.xlu0 %1367  ;;  %vm1290_vm14 = vweird.f32 %v2249_v39  ;;  %1441 = vmatpush.msra.mxu2 %v1419_v26 }
 0x2eb   : > { %v1202_v49 = vmul.f32 %v2245_v27, %v1201_v40  ;;  %2250 = vrcp.f32 %v1368_v47  ;;  %2091 = vmatmul.msk.f32.vlgmr.msra.gmra.mxu1 %vm771_vm2, %v1043_v14  ;;  %vm1291_vm3 = vmor %vm1289_vm15, %vm1290_vm14  ;;  %v1380_v5 = vand.u32 2147483648, %v1368_v47  ;;  %vm1374_vm6 = vweird.f32 %v1368_v47  ;;  %v2212_v40 = vld [vmem:[%s3165_s9] ss:$0 sm:$0xff] }
 0x2ec   : > { %v1117_v50 = vmul.f32 %v2247_v29, %v1116_v42  ;;  %v1286_v51 = vsub.f32 1.0, %v1285_v46  ;;  %vm1414_vm14 = vcmask 261344   ;;  %2252 = vrcp.f32 %v2442_v45 }
 0x2ed   : > { %v1203_v52 = vadd.f32 %v2245_v27, %v1202_v49  ;;  %v1381_v12 = vor.u32 1.1754944e-38, %v1380_v5  ;;  %v2445_v45 = vmov 2131351028  }
 0x2ee   : > { %v1118_v20 = vadd.f32 %v2247_v29, %v1117_v50  ;;  %v1287_v54 = vmul.f32 %v2249_v39, %v1286_v51 }
 0x2ef   : > { %v1207_v56 = vsel %vm1206_vm10, %v2245_v27, %v1203_v52  ;;  %v1418_v27 = vld [vmem:[#allocation9 + $0x8] sm:$0xff]  ;;  %vm1074_vm10 = vcmask 130144  }
 0x2f0   : > { %v1122_v57 = vsel %vm1121_vm11, %v2247_v29, %v1118_v20  ;;  %v1212_v58 = vsel %vm1209_vm13, %v1211_v53, %v1207_v56  ;;  %v1288_v59 = vadd.f32 %v2249_v39, %v1287_v54  ;;  %1442 = vmatpush.msra.mxu2 %v1418_v27  ;;  %vm1159_vm11 = vcmask 162944   ;;  %v1522_v56 = vld [vmem:[%s3170_s14 + $0x18] sm:$0xff] }
 0x2f1   : > { %v2251_v60 = vpop.eup %2250  ;;  %v1127_v61 = vsel %vm1124_vm12, %v1126_v55, %v1122_v57  ;;  %v1213_v63 = vmul.f32 %v2774_v30, %v1212_v58  ;;  %v1378_v30 = vand.u32 2147483647, %v1368_v47  ;;  %vm1244_vm12 = vcmask 195744   ;;  %v1491_v55 = vld [vmem:[%s3168_s12 + $0x18] sm:$0xff]  ;;  %1539 = vmatpush.msrb.mxu0 %v1522_v56  ;;  %v1490_v57 = vld [vmem:[%s3168_s12 + $0x10] sm:$0xff] }
 0x2f2   : > { %v1370_v1 = vmul.f32 %v2251_v60, %v1368_v47  ;;  %v1128_v2 = vmul.f32 %v2776_v31, %v1127_v61  ;;  %v1292_v36 = vsel %vm1291_vm3, %v2249_v39, %v1288_v59  ;;  %vm1375_vm5 = vweird.f32 %v2251_v60  ;;  %1443 = vmatpush.msra.mxu2 %v1417_v28  ;;  %v2253_v46 = vpop.eup %2252  ;;  %v1521_v58 = vld [vmem:[%s3170_s14 + $0x10] sm:$0xff]  ;;  %v1489_v59 = vld [vmem:[%s3168_s12 + $0x8] sm:$0xff]  ;;  %v1488_v61 = vld [vmem:[%s3168_s12] sm:$0xff] }
 0x2f3   : > { %2097 = vmatmul.msk.f32.vlgmr.msrb.gmra.mxu1 %vm771_vm2, %v1213_v63  ;;  %v1297_v8 = vsel %vm1294_vm4, %v1296_v4, %v1292_v36  ;;  %vm1376_vm7 = vmor %vm1374_vm6, %vm1375_vm5  ;;  %vm1379_vm8 = vcmp.eq.f32.partialorder %v1378_v30, 8.507059e+37  ;;  %vm1329_vm13 = vcmask 228544   ;;  %v1455_v47 = vmul.f32 32.0, %v2253_v46  ;;  %1540 = vmatpush.msrb.mxu0 %v1521_v58  ;;  %v2213_v30 = vld [vmem:[%s3166_s10] ss:$0 sm:$0xff] }
 0x2f4   : > { %v1371_v3 = vsub.f32 1.0, %v1370_v1  ;;  %2094 = vmatmul.msk.f32.vlgmr.msrb.gmra.mxu3 %vm771_vm2, %v1128_v2  ;;  %v1298_v13 = vmul.f32 %v2782_v35, %v1297_v8  ;;  %vm1459_vm15 = vweird.f32 %v2253_v46 }
 0x2f5   : > { %v1456_v48 = vsub.f32 1.0, %v1455_v47 }
 0x2f6   : > { %v1372_v6 = vmul.f32 %v2251_v60, %v1371_v3 }
 0x2f7   : > { %v1457_v49 = vmul.f32 %v2253_v46, %v1456_v48  ;;  %v2446_v48 = vmov 2102212464  }
 0x2f8   : > { %v1373_v10 = vadd.f32 %v2251_v60, %v1372_v6  ;;  %v1300_v11 = vpop.permute.xlu1 %1299 }
 0x2f9   : > { %1320 = vmatpush.msra.mxu3 %v1300_v11  ;;  %v1458_v50 = vadd.f32 %v2253_v46, %v1457_v49  ;;  %v2214_v11 = vld [vmem:[%s3167_s11] ss:$0 sm:$0xff] }
 0x2fa   : > { %v1377_v31 = vsel %vm1376_vm7, %v2251_v60, %v1373_v10  ;;  %v1520_v60 = vld [vmem:[%s3170_s14 + $0x8] sm:$0xff] }
 0x2fb   : > { %v1382_v15 = vsel %vm1379_vm8, %v1381_v12, %v1377_v31  ;;  %v2835_v51 = vsel %vm1459_vm15, %v2253_v46, %v1458_v50  ;;  %1511 = vmatpush.msrb.mxu3 %v1491_v55  ;;  %1541 = vmatpush.msrb.mxu0 %v1520_v60 }
 0x2fc   : > { %2100 = vmatmul.msk.f32.vlgmr.msra.gmra.mxu3 %vm771_vm2, %v1298_v13  ;;  %v1383_v16 = vmul.f32 %v2786_v43, %v1382_v15  ;;  %v2216_v13 = vld [vmem:[%s3169_s13] ss:$0 sm:$0xff] }
 0x2fd   : > { %v1385_v17 = vpop.permute.xlu0 %1384  ;;  %1512 = vmatpush.msrb.mxu3 %v1490_v57  ;;  %1542 = vmatpush.msrb.mxu0 %v1519_v62  ;;  %v2217_v15 = vld [vmem:[%s3172_s16] ss:$0 sm:$0xff] }
 0x2fe   : > { %v816_v18 = vpop.f32.mrf.mxu3  ;;  %1405 = vmatpush.msra.mxu1 %v1385_v17 }
 0x2ff   : > { %819 = vst.msk [vmem:[#allocation2] sm:$0xff] %vm743_vm1, %v816_v18  ;;  %2103 = vmatmul.msk.f32.vlgmr.msra.gmra.mxu1 %vm771_vm2, %v1383_v16  ;;  %vm904_vm1 = vcmask 64544   ;;  %1513 = vmatpush.msrb.mxu3 %v1489_v59 }
 0x301   : > { %1514 = vmatpush.msrb.mxu3 %v1488_v61 }
 0x35c   : > { %v897_v19 = vpop.f32.mrf.mxu1 }
 0x35d   : > { %901 = vrot.lane.b32.xlu2 %v897_v19, %s2435_s29  ;;  %s3078_s29 = sld [smem:[#allocation3]] }
 0x368   : > { %v1067_v9 = vpop.f32.mrf.mxu1 }
 0x369   : > { %1071 = vrot.lane.b32.xlu0 %v1067_v9, %s2436_s6  ;;  %v982_v21 = vpop.f32.mrf.mxu3  ;;  %s1751_s6 = ssub.f32 0.0, %s3078_s29 }
 0x36a   : > { %986 = vrot.lane.b32.xlu1 %v982_v21, %s2437_s25 }
 0x370   : > { %v1237_v35 = vpop.f32.mrf.mxu1 }
 0x372   : > { %1241 = vrot.lane.b32.xlu1 %v1237_v35, %s2438_s21  ;;  %s1916_s21 = ssub.f32 1.0, %s3078_s29 }
 0x377   : > { %v1152_v43 = vpop.f32.mrf.mxu3 }
 0x378   : > { %1156 = vrot.lane.b32.xlu2 %v1152_v43, %s2439_s0 }
 0x37c   : > { %v1407_v22 = vpop.f32.mrf.mxu1 }
 0x37f   : > { %v1322_v23 = vpop.f32.mrf.mxu3 }
 0x380   : > { %1326 = vrot.lane.b32.xlu0 %v1322_v23, %s2440_s23  ;;  %1411 = vrot.lane.b32.xlu2 %v1407_v22, %s2441_s18  ;;  %v2215_v23 = vld [vmem:[%s3171_s15] ss:$0 sm:$0xff]  ;;  %s3219_s18 = sld [smem:[#allocation27_spill]] }
 0x3b7   : > { %v902_v24 = vpop.permute.xlu2 %901 }
 0x3b8   : > { %905 = vst.msk [vmem:[#allocation2] sm:$0xff] %vm904_vm1, %v902_v24 }
 0x3d2   : > { %v1157_v33 = vpop.permute.xlu2 %1156 }
 0x3da   : > { %v1412_v38 = vpop.permute.xlu2 %1411 }
 0x3db   : > { %v1072_v32 = vpop.permute.xlu0 %1071 }
 0x3dc   : > { %v987_v29 = vpop.permute.xlu1 %986 }
 0x3dd   : > { %990 = vst.msk [vmem:[#allocation2] sm:$0xff] %vm989_vm9, %v987_v29 }
 0x3de   : > { %1075 = vst.msk [vmem:[#allocation2] sm:$0xff] %vm1074_vm10, %v1072_v32 }
 0x3df   : > { %1160 = vst.msk [vmem:[#allocation2] sm:$0xff] %vm1159_vm11, %v1157_v33 }
 0x3e4   : > { %v1242_v34 = vpop.permute.xlu1 %1241 }
 0x3e5   : > { %1245 = vst.msk [vmem:[#allocation2] sm:$0xff] %vm1244_vm12, %v1242_v34 }
 0x3f2   : > { %v1327_v37 = vpop.permute.xlu0 %1326 }
 0x3f3   : > { %1330 = vst.msk [vmem:[#allocation2] sm:$0xff] %vm1329_vm13, %v1327_v37 }
 0x3f4   : > { %1415 = vst.msk [vmem:[#allocation2] sm:$0xff] %vm1414_vm14, %v1412_v38 }
 0x3fb   : > { %v1416_v39 = vld [vmem:[#allocation2] sm:$0xff] }
 0x3fc   : > { %2104 = vmatmul.msk.f32.vlgmr.msra.gmra.mxu2 %vm663_vm0, %v1416_v39 }
 0x47f   : > { %v1445_v41 = vpop.f32.mrf.mxu2 }
 0x480   : > { %v1446_v14 = vadd.f32 %v2212_v40, %v1445_v41  ;;  %v2443_v40 = vmov 683565275  }
 0x482   : > { %v1448_v42 = vadd.f32 %v1446_v14, %v2689_v7  ;;  %v2444_v14 = vmov 2475754826  }
 0x484   : > { %v1451_v44 = vsel %vm663_vm0, %v1448_v42, 0.0 }
 0x485   : > { %1452 = vadd.xlane.f32.xlu1 %v1451_v44 }
 0x4f8   : > { %v1453_v52 = vpop.xlane.xlu1 %1452 }
 0x4f9   : > { %v1461_v20 = vmul.f32 %v2835_v51, %v1453_v52  ;;  %v2447_v52 = vmov 920167782  }
 0x4fb   : > { %v1462_v53 = vsub.f32 %v1448_v42, %v1461_v20 }
 0x4fd   : > { %v1463_v54 = vmul.f32 %v1462_v53, %v1462_v53 }
 0x4ff   : > { %v1464_v7 = vsel %vm663_vm0, %v1463_v54, 0.0  ;;  %v2448_v54 = vmov 1326507024  }
 0x500   : > { %1465 = vadd.xlane.f32.xlu0 %v1464_v7 }
 0x573   : > { %v1466_v63 = vpop.xlane.xlu0 %1465 }
 0x574   : > { %v1467_v0 = vmul.f32 %v1466_v63, %v2835_v51 }
 0x576   : > { %v1468_v1 = vadd.f32 1e-05, %v1467_v0 }
 0x578   : > { %2254 = vrsqrt.f32 %v1468_v1  ;;  %vm1475_vm4 = vweird.f32 %v1468_v1 }
 0x57e   : > { %v2255_v2 = vpop.eup %2254 }
 0x57f   : > { %v1470_v36 = vmul.f32 %v2255_v2, %v1468_v1  ;;  %vm1476_vm3 = vweird.f32 %v2255_v2 }
 0x580   : > { %vm1477_vm5 = vmor %vm1475_vm4, %vm1476_vm3 }
 0x581   : > { %v1471_v3 = vmul.f32 %v2255_v2, %v1470_v36 }
 0x583   : > { %v1472_v4 = vmul.f32 0.5, %v1471_v3 }
 0x585   : > { %v1473_v5 = vsub.f32 1.5, %v1472_v4 }
 0x587   : > { %v1474_v6 = vmul.f32 %v2255_v2, %v1473_v5 }
 0x589   : > { %v1478_v8 = vsel %vm1477_vm5, %v2255_v2, %v1474_v6 }
 0x58a   : > { %v1479_v10 = vmul.f32 %v1478_v8, %v1462_v53 }
 0x58c   : > { %v1483_v12 = vmul.f32 %v2213_v30, %v1479_v10 }
 0x58e   : > { %v2870_v31 = vadd.f32 %v2214_v11, %v1483_v12 }
 0x590   : > { %2105 = vmatmul.msk.f32.vlgmr.msrb.gmra.mxu3 %vm663_vm0, %v2870_v31  ;;  %2106 = vmatmul.msk.f32.vlgmr.msrb.gmra.mxu0 %vm663_vm0, %v2870_v31 }
 0x60d   : > { %v1544_v24 = vpop.f32.mrf.mxu0 }
 0x60e   : > { %v2894_v28 = vadd.f32 %v2215_v23, %v1544_v24 }
 0x610   : > { %v2897_v38 = vmul.f32 0.70710677, %v2894_v28 }
 0x612   : > { %v2915_v62 = vand.u32 2147483647, %v2897_v38 }
 0x613   : > { %v1516_v16 = vpop.f32.mrf.mxu3 }
 0x614   : > { %v1517_v17 = vadd.f32 %v2216_v13, %v1516_v16  ;;  %v1552_v13 = vmul.f32 0.3275911, %v2915_v62 }
 0x616   : > { %v2882_v18 = vadd.f32 %v2217_v15, %v1517_v17  ;;  %v2885_v9 = vsub.f32 %v1517_v17, %v2217_v15 }
 0x618   : > { %v1596_v19 = vand.u32 2139095040, %v2882_v18  ;;  %v1593_v35 = vand.u32 2147483647, %v2882_v18  ;;  %v1756_v22 = vand.u32 2139095040, %v2885_v9  ;;  %v1753_v4 = vand.u32 2147483647, %v2885_v9 }
 0x61a   : > { %v1597_v21 = vshrl.u32 %v1596_v19, 23  ;;  %v1600_v26 = vand.u32 8388607, %v1593_v35  ;;  %v1757_v27 = vshrl.u32 %v1756_v22, 23  ;;  %v1760_v24 = vand.u32 8388607, %v1753_v4 }
 0x61c   : > { %v2107_v43 = vadd.s32 4294967169, %v1597_v21  ;;  %v1601_v33 = vor.u32 8388608, %v1600_v26  ;;  %v2110_v37 = vadd.s32 4294967169, %v1757_v27 }
 0x61e   : > { %v1603_v25 = vadd.s32 1, %v2107_v43  ;;  %v2911_v57 = vshll.u32 %v1601_v33, 8  ;;  %v1763_v58 = vadd.s32 1, %v2110_v37 }
 0x620   : > { %vm1604_vm6 = vcmp.gt.s32.totalorder %v1603_v25, 0  ;;  %v1642_v30 = vand.u32 65535, %v2911_v57  ;;  %vm1764_vm10 = vcmp.gt.s32.totalorder %v1763_v58, 0  ;;  %v1643_v8 = vshrl.u32 %v2911_v57, 16 }
 0x621   : > { %v1605_v29 = vsel %vm1604_vm6, %v1603_v25, 0  ;;  %v1765_v43 = vsel %vm1764_vm10, %v1763_v58, 0 }
 0x622   : > { %v1607_v32 = vand.u32 31, %v1605_v29  ;;  %v2899_v39 = vshrl.u32 %v1605_v29, 5 }
 0x624   : > { %v1608_v34 = vsub.s32 32, %v1607_v32  ;;  %v1610_v41 = vshll.u32 %v2443_v40, %v1607_v32  ;;  %v1613_v42 = vshll.u32 %v2444_v14, %v1607_v32  ;;  %v1616_v47 = vshll.u32 %v2445_v45, %v1607_v32 }
 0x625   : > { %v1619_v49 = vshll.u32 %v2446_v48, %v1607_v32  ;;  %v1622_v53 = vshll.u32 %v2447_v52, %v1607_v32  ;;  %vm1625_vm7 = vcmp.lt.s32.totalorder %v2899_v39, 1  ;;  %vm1628_vm8 = vcmp.lt.s32.totalorder %v2899_v39, 4 }
 0x626   : > { %v1611_v44 = vshrl.u32 %v2444_v14, %v1608_v34  ;;  %v1614_v46 = vshrl.u32 %v2445_v45, %v1608_v34  ;;  %v1617_v50 = vshrl.u32 %v2446_v48, %v1608_v34  ;;  %v1620_v20 = vshrl.u32 %v2447_v52, %v1608_v34 }
 0x627   : > { %v1623_v7 = vshrl.u32 %v2448_v54, %v1608_v34  ;;  %vm1627_vm1 = vcmp.lt.s32.totalorder %v2899_v39, 3  ;;  %vm1626_vm9 = vcmp.lt.s32.totalorder %v2899_v39, 2  ;;  %v1609_v17 = vshrl.u32 %v2443_v40, %v1608_v34 }
 0x628   : > { %v1612_v55 = vor.u32 %v1611_v44, %v1610_v41  ;;  %v1615_v56 = vor.u32 %v1614_v46, %v1613_v42  ;;  %v1618_v59 = vor.u32 %v1617_v50, %v1616_v47  ;;  %v1621_v60 = vor.u32 %v1620_v20, %v1619_v49 }
 0x629   : > { %v1624_v61 = vor.u32 %v1623_v7, %v1622_v53  ;;  %v1767_v34 = vand.u32 31, %v1765_v43  ;;  %v2449_v46 = vmov 0   ;;  %v1761_v7 = vor.u32 8388608, %v1760_v24 }
 0x62a   : > { %v1633_v63 = vsel %vm1625_vm7, %v1612_v55, %v1615_v56  ;;  %v1634_v0 = vsel %vm1628_vm8, %v1621_v60, 920167782  ;;  %v1637_v1 = vsel %vm1625_vm7, %v1615_v56, %v1618_v59  ;;  %v1630_v15 = vsel %vm1628_vm8, %v1618_v59, 2102212464 }
 0x62b   : > { %v1638_v2 = vsel %vm1628_vm8, %v1624_v61, 1326507024  ;;  %v1635_v36 = vsel %vm1627_vm1, %v1618_v59, %v1634_v0  ;;  %v1629_v25 = vsel %vm1625_vm7, %v1609_v17, %v1612_v55  ;;  %v1631_v26 = vsel %vm1627_vm1, %v1615_v56, %v1630_v15 }
 0x62c   : > { %v1639_v3 = vsel %vm1627_vm1, %v1621_v60, %v1638_v2  ;;  %v1636_v5 = vsel %vm1626_vm9, %v1633_v63, %v1635_v36  ;;  %v1632_v55 = vsel %vm1626_vm9, %v1629_v25, %v1631_v26  ;;  %v2955_v63 = vsub.s32 32, %v1767_v34 }
 0x62d   : > { %v1640_v6 = vsel %vm1626_vm9, %v1637_v1, %v1639_v3  ;;  %v1666_v12 = vand.u32 65535, %v1636_v5  ;;  %v1667_v16 = vshrl.u32 %v1636_v5, 16  ;;  %v2957_v36 = vshrl.u32 %v1765_v43, 5 }
 0x62e   : > { %v1644_v10 = vand.u32 65535, %v1640_v6  ;;  %v1645_v11 = vshrl.u32 %v1640_v6, 16  ;;  %v1770_v39 = vshll.u32 %v2443_v40, %v1767_v34  ;;  %v1771_v6 = vshrl.u32 %v2444_v14, %v2955_v63 }
 0x62f   : > { %v1669_v22 = vmul.u32 %v1667_v16, %v1642_v30  ;;  %v1670_v23 = vmul.u32 %v1666_v12, %v1643_v8  ;;  %v1668_v33 = vmul.u32 %v1666_v12, %v1642_v30  ;;  %v1671_v44 = vmul.u32 %v1667_v16, %v1643_v8 }
 0x630   : > { %v1647_v19 = vmul.u32 %v1645_v11, %v1642_v30  ;;  %v1648_v21 = vmul.u32 %v1644_v10, %v1643_v8  ;;  %v1646_v27 = vmul.u32 %v1644_v10, %v1642_v30  ;;  %v1649_v32 = vmul.u32 %v1645_v11, %v1643_v8 }
 0x631   : > { %v1672_v37 = vshll.u32 %v1669_v22, 16  ;;  %v1674_v49 = vshll.u32 %v1670_v23, 16  ;;  %v1673_v1 = vshrl.u32 %v1669_v22, 16  ;;  %v1675_v5 = vshrl.u32 %v1670_v23, 16 }
 0x632   : > { %v1650_v29 = vshll.u32 %v1647_v19, 16  ;;  %v1652_v41 = vshll.u32 %v1648_v21, 16  ;;  %v1651_v59 = vshrl.u32 %v1647_v19, 16  ;;  %v1653_v0 = vshrl.u32 %v1648_v21, 16 }
 0x633   : > { %vm1676_vm12 = vc.u32 %v1668_v33, %v1672_v37  ;;  %v1678_v50 = vadd.s32 %v1672_v37, %v1668_v33  ;;  %v1773_v8 = vshll.u32 %v2444_v14, %v1767_v34  ;;  %v1774_v10 = vshrl.u32 %v2445_v45, %v2955_v63 }
 0x634   : > { %vm1654_vm11 = vc.u32 %v1646_v27, %v1650_v29  ;;  %v1656_v42 = vadd.s32 %v1650_v29, %v1646_v27  ;;  %v1677_v53 = vsel %vm1676_vm12, 1, %v2449_v46  ;;  %v1777_v11 = vshrl.u32 %v2446_v48, %v2955_v63 }
 0x635   : > { %v1655_v47 = vsel %vm1654_vm11, 1, %v2449_v46  ;;  %v1679_v58 = vadd.s32 %v1677_v53, %v1671_v44  ;;  %vm1680_vm14 = vc.u32 %v1678_v50, %v1674_v49  ;;  %v2969_v15 = vadd.s32 %v1678_v50, %v1674_v49 }
 0x636   : > { %v1657_v20 = vadd.s32 %v1655_v47, %v1649_v32  ;;  %vm1658_vm13 = vc.u32 %v1656_v42, %v1652_v41  ;;  %v1681_v61 = vsel %vm1680_vm14, 1, %v2449_v46  ;;  %v1779_v16 = vshll.u32 %v2446_v48, %v1767_v34 }
 0x637   : > { %v1659_v56 = vsel %vm1658_vm13, 1, %v2449_v46  ;;  %v1683_v2 = vadd.s32 %v1681_v61, %v1679_v58  ;;  %v1780_v17 = vshrl.u32 %v2447_v52, %v2955_v63  ;;  %v2974_v21 = vor.u32 %v1771_v6, %v1770_v39 }
 0x638   : > { %v1661_v60 = vadd.s32 %v1659_v56, %v1657_v20  ;;  %v2976_v43 = vor.u32 %v1774_v10, %v1773_v8  ;;  %v1776_v14 = vshll.u32 %v2445_v45, %v1767_v34  ;;  %v2979_v22 = vadd.f32 1.0, %v1552_v13 }
 0x639   : > { %v1684_v30 = vadd.s32 %v1683_v2, %v1673_v1  ;;  %v1781_v23 = vor.u32 %v1780_v17, %v1779_v16  ;;  %v1782_v48 = vshll.u32 %v2447_v52, %v1767_v34  ;;  %v1783_v26 = vshrl.u32 %v2448_v54, %v2955_v63 }
 0x63a   : > { %v1662_v3 = vadd.s32 %v1661_v60, %v1651_v59  ;;  %v2983_v25 = vor.u32 %v1777_v11, %v1776_v14  ;;  %v1686_v27 = vmul.u32 %v2911_v57, %v1632_v55  ;;  %vm1785_vm3 = vcmp.lt.s32.totalorder %v2957_v36, 1 }
 0x63b   : > { %v1685_v19 = vadd.s32 %v1684_v30, %v1675_v5  ;;  %v2990_v29 = vshll.u32 %v1761_v7, 8  ;;  %v1784_v13 = vor.u32 %v1783_v26, %v1782_v48  ;;  %vm1788_vm4 = vcmp.lt.s32.totalorder %v2957_v36, 4 }
 0x63c   : > { %v2967_v12 = vadd.s32 %v1662_v3, %v1653_v0  ;;  %v1793_v32 = vsel %vm1785_vm3, %v2974_v21, %v2976_v43  ;;  %2256 = vrcp.f32 %v2979_v22  ;;  %vm1787_vm5 = vcmp.lt.s32.totalorder %v2957_v36, 3 }
 0x63d   : > { %v1689_v24 = vadd.s32 1, %v1685_v19  ;;  %v1794_v54 = vsel %vm1788_vm4, %v1781_v23, 920167782  ;;  %vm1786_vm6 = vcmp.lt.s32.totalorder %v2957_v36, 2  ;;  %v1797_v33 = vsel %vm1785_vm3, %v2976_v43, %v2983_v25 }
 0x63e   : > { %vm1688_vm15 = vc.u32 %v2967_v12, %v2969_v15  ;;  %v1795_v57 = vsel %vm1787_vm5, %v2983_v25, %v1794_v54  ;;  %v1798_v37 = vsel %vm1788_vm4, %v1784_v13, 1326507024  ;;  %v1802_v47 = vand.u32 65535, %v2990_v29 }
 0x63f   : > { %v1690_v45 = vsel %vm1688_vm15, %v1689_v24, %v1685_v19  ;;  %v1796_v41 = vsel %vm1786_vm6, %v1793_v32, %v1795_v57  ;;  %v1799_v42 = vsel %vm1787_vm5, %v1781_v23, %v1798_v37  ;;  %v1803_v55 = vshrl.u32 %v2990_v29, 16 }
 0x640   : > { %v1691_v52 = vadd.s32 %v1690_v45, %v1686_v27  ;;  %v1800_v44 = vsel %vm1786_vm6, %v1797_v33, %v1799_v42  ;;  %v1827_v49 = vshrl.u32 %v1796_v41, 16  ;;  %v1826_v7 = vand.u32 65535, %v1796_v41 }
 0x641   : > { %v1804_v20 = vand.u32 65535, %v1800_v44  ;;  %v1805_v53 = vshrl.u32 %v1800_v44, 16  ;;  %v1769_v57 = vshrl.u32 %v2443_v40, %v2955_v63  ;;  %v1790_v33 = vsel %vm1788_vm4, %v2983_v25, 2102212464 }
 0x642   : > { %v1692_v34 = vadd.s32 536870912, %v1691_v52  ;;  %v1829_v56 = vmul.u32 %v1827_v49, %v1802_v47  ;;  %v3021_v58 = vpop.eup %2256  ;;  %v1830_v5 = vmul.u32 %v1826_v7, %v1803_v55  ;;  %v1828_v6 = vmul.u32 %v1826_v7, %v1802_v47 }
 0x643   : > { %v1807_v60 = vmul.u32 %v1805_v53, %v1802_v47  ;;  %v1808_v61 = vmul.u32 %v1804_v20, %v1803_v55  ;;  %v1806_v2 = vmul.u32 %v1804_v20, %v1802_v47  ;;  %v1555_v39 = vmul.f32 %v3021_v58, %v2979_v22 }
 0x644   : > { %v3018_v50 = vshrl.u32 %v1692_v34, 30  ;;  %v1832_v0 = vshll.u32 %v1829_v56, 16  ;;  %v1831_v30 = vmul.u32 %v1827_v49, %v1803_v55  ;;  %v1809_v10 = vmul.u32 %v1805_v53, %v1803_v55 }
 0x645   : > { %v1810_v3 = vshll.u32 %v1807_v60, 16  ;;  %v1812_v11 = vshll.u32 %v1808_v61, 16  ;;  %v1834_v23 = vshll.u32 %v1830_v5, 16  ;;  %v1811_v32 = vshrl.u32 %v1807_v60, 16 }
 0x646   : > { %v1694_v59 = vshll.u32 %v3018_v50, 30  ;;  %vm1836_vm1 = vc.u32 %v1828_v6, %v1832_v0  ;;  %v1838_v26 = vadd.s32 %v1832_v0, %v1828_v6  ;;  %v1556_v54 = vsub.f32 1.0, %v1555_v39 }
 0x647   : > { %vm1814_vm8 = vc.u32 %v1806_v2, %v1810_v3  ;;  %v1816_v17 = vadd.s32 %v1810_v3, %v1806_v2  ;;  %v1837_v24 = vsel %vm1836_vm1, 1, %v2449_v46  ;;  %v1813_v34 = vshrl.u32 %v1808_v61, 16 }
 0x648   : > { %v1695_v1 = vsub.s32 %v1691_v52, %v1694_v59  ;;  %v1815_v16 = vsel %vm1814_vm8, 1, %v2449_v46  ;;  %v1839_v27 = vadd.s32 %v1837_v24, %v1831_v30  ;;  %vm1840_vm10 = vc.u32 %v1838_v26, %v1834_v23 }
 0x649   : > { %v1817_v14 = vadd.s32 %v1815_v16, %v1809_v10  ;;  %vm1818_vm9 = vc.u32 %v1816_v17, %v1812_v11  ;;  %v1841_v37 = vsel %vm1840_vm10, 1, %v2449_v46  ;;  %v1687_v44 = vadd.s32 %v2969_v15, %v2967_v12 }
 0x64a   : > { %vm1696_vm7 = vcmp.lt.s32.totalorder %v1695_v1, 0  ;;  %v1697_v8 = vsub.s32 0, %v1695_v1  ;;  %v1819_v45 = vsel %vm1818_vm9, 1, %v2449_v46  ;;  %v1843_v42 = vadd.s32 %v1841_v37, %v1839_v27 }
 0x64b   : > { %v1821_v52 = vadd.s32 %v1819_v45, %v1817_v14  ;;  %v1789_v49 = vsel %vm1785_vm3, %v1769_v57, %v2974_v21  ;;  %v1833_v20 = vshrl.u32 %v1829_v56, 16  ;;  %v1791_v25 = vsel %vm1787_vm5, %v2976_v43, %v1790_v33 }
 0x64c   : > { %v1698_v19 = vsel %vm1696_vm7, %v1697_v8, %v1695_v1  ;;  %v1557_v53 = vmul.f32 %v3021_v58, %v1556_v54  ;;  %v1835_v7 = vshrl.u32 %v1830_v5, 16  ;;  %v1842_v60 = vadd.s32 %v1838_v26, %v1834_v23 }
 0x64d   : > { %v1699_v48 = vclz %v1698_v19  ;;  %v1822_v41 = vadd.s32 %v1821_v52, %v1811_v32  ;;  %v1844_v55 = vadd.s32 %v1843_v42, %v1833_v20  ;;  %v1792_v21 = vsel %vm1786_vm6, %v1789_v49, %v1791_v25 }
 0x64e   : > { %v1558_v43 = vadd.f32 %v3021_v58, %v1557_v53  ;;  %vm1560_vm13 = vweird.f32 %v3021_v58  ;;  %v1846_v5 = vmul.u32 %v2990_v29, %v1792_v21  ;;  %vm1559_vm14 = vweird.f32 %v2979_v22 }
 0x64f   : > { %v2108_v13 = vadd.s32 4294967294, %v1699_v48  ;;  %v3043_v46 = vadd.s32 %v1822_v41, %v1813_v34  ;;  %v1845_v56 = vadd.s32 %v1844_v55, %v1835_v7  ;;  %v1563_v36 = vand.u32 2147483647, %v2979_v22  ;;  %vm1561_vm15 = vmor %vm1559_vm14, %vm1560_vm13 }
 0x650   : > { %v1562_v10 = vsel %vm1561_vm15, %v3021_v58, %v1558_v43  ;;  %vm1595_vm4 = vcmp.lt.s32.totalorder %v2882_v18, 0  ;;  %vm3063_vm5 = vcmp.le.f32.partialorder %v1593_v35, 0.7853982  ;;  %v1717_v24 = vsub.s32 4, %v3018_v50 }
 0x651   : > { %vm2109_vm11 = vcmp.lt.s32.totalorder %v2108_v13, 0  ;;  %vm1848_vm12 = vc.u32 %v3043_v46, %v1842_v60  ;;  %v1849_v2 = vadd.s32 1, %v1845_v56  ;;  %vm1564_vm3 = vcmp.eq.f32.partialorder %v1563_v36, 8.507059e+37 }
 0x652   : > { %v1702_v47 = vsel %vm2109_vm11, 0, %v2108_v13  ;;  %v1718_v52 = vsel %vm1595_vm4, %v1717_v24, %v3018_v50  ;;  %v1847_v7 = vadd.s32 %v1842_v60, %v3043_v46  ;;  %v1578_v46 = vsub.f32 0.0, %v2915_v62 }
 0x653   : > { %v1703_v40 = vsub.s32 32, %v1702_v47  ;;  %v1707_v63 = vsub.s32 4294967266, %v1702_v47  ;;  %v1704_v59 = vshll.u32 %v1695_v1, %v1702_v47  ;;  %v1565_v1 = vand.u32 2147483648, %v2979_v22 }
 0x654   : > { %v1850_v39 = vsel %vm1848_vm12, %v1849_v2, %v1845_v56  ;;  %v1720_v41 = vsel %vm3063_vm5, 0, %v1718_v52  ;;  %vm1736_vm10 = vweird.f32 %v2882_v18  ;;  %v1579_v22 = vmul.f32 %v1578_v46, %v2915_v62 }
 0x655   : > { %v1705_v12 = vshrl.u32 %v1687_v44, %v1703_v40  ;;  %v1708_v15 = vadd.s32 127, %v1707_v63  ;;  %v1851_v8 = vadd.s32 %v1850_v39, %v1846_v5  ;;  %v1566_v17 = vor.u32 1.1754944e-38, %v1565_v1 }
 0x656   : > { %v1737_v63 = vadd.s32 3, %v1720_v41  ;;  %vm1755_vm11 = vcmp.lt.s32.totalorder %v2885_v9, 0  ;;  %vm3090_vm12 = vcmp.le.f32.partialorder %v1753_v4, 0.7853982 }
 0x657   : > { %v1706_v61 = vor.u32 %v1705_v12, %v1704_v59  ;;  %v1709_v0 = vshll.u32 %v1708_v15, 23  ;;  %v1852_v16 = vadd.s32 536870912, %v1851_v8  ;;  %v3058_v29 = vsel %vm1564_vm3, %v1566_v17, %v1562_v10 }
 0x658   : > { %v1569_v26 = vmul.f32 1.0614054, %v3058_v29  ;;  %v1738_v56 = vand.u32 3, %v1737_v63  ;;  %vm1896_vm3 = vweird.f32 %v2885_v9 }
 0x659   : > { %v1710_v3 = vor.u32 4788187, %v1709_v0  ;;  %v1713_v30 = vcvt.s32.f32 %v1706_v61  ;;  %v3056_v14 = vshrl.u32 %v1852_v16, 30 }
 0x65a   : > { %v1570_v54 = vadd.f32 -1.4531521, %v1569_v26  ;;  %vm1740_vm8 = vcmp.eq.s32.totalorder %v1738_v56, 0  ;;  %vm1743_vm1 = vcmp.eq.s32.totalorder %v1738_v56, 2  ;;  %vm1739_vm9 = vcmp.lt.s32.totalorder %v1738_v56, 2 }
 0x65b   : > { %v1711_v6 = vand.u32 2147483647, %v1710_v3  ;;  %v1854_v58 = vshll.u32 %v3056_v14, 30  ;;  %v1580_v26 = vmul.f32 1.442695, %v1579_v22 }
 0x65c   : > { %v1571_v49 = vmul.f32 %v1570_v54, %v3058_v29 }
 0x65d   : > { %v1714_v11 = vmul.f32 %v1713_v30, %v1711_v6  ;;  %v1855_v45 = vsub.s32 %v1851_v8, %v1854_v58  ;;  %v1748_v8 = vstv %s3078_s29  ;;  %2258 = vpow2.f32 %v1580_v26  ;;  %v2218_v26 = vld [vmem:[%s3219_s18] ss:$0 sm:$0xff] }
 0x65e   : > { %v1572_v12 = vadd.f32 1.4214138, %v1571_v49 }
 0x65f   : > { %v1715_v19 = vxor.u32 2147483648, %v1714_v11  ;;  %vm1856_vm6 = vcmp.lt.s32.totalorder %v1855_v45, 0  ;;  %v1857_v35 = vsub.s32 0, %v1855_v45 }
 0x660   : > { %v1573_v39 = vmul.f32 %v1572_v12, %v3058_v29 }
 0x661   : > { %v1716_v23 = vsel %vm1595_vm4, %v1715_v19, %v1714_v11  ;;  %v1858_v37 = vsel %vm1856_vm6, %v1857_v35, %v1855_v45  ;;  %vm1914_vm4 = vcmask 130112  }
 0x662   : > { %v1719_v48 = vsel %vm3063_vm5, %v2882_v18, %v1716_v23  ;;  %v1859_v34 = vclz %v1858_v37  ;;  %v1574_v17 = vadd.f32 -0.28449672, %v1573_v39  ;;  %vm1923_vm5 = vcmask 261248  }
 0x663   : > { %v1721_v27 = vmul.f32 %v1719_v48, %v1719_v48 }
 0x664   : > { %v2111_v47 = vadd.s32 4294967294, %v1859_v34 }
 0x665   : > { %v1722_v13 = vmul.f32 -0.001358992, %v1721_v27  ;;  %v1729_v32 = vmul.f32 -0.00019511016, %v1721_v27 }
 0x666   : > { %vm2112_vm7 = vcmp.lt.s32.totalorder %v2111_v47, 0 }
 0x667   : > { %v1723_v57 = vadd.f32 0.041655596, %v1722_v13  ;;  %v1730_v33 = vadd.f32 0.008332121, %v1729_v32  ;;  %v1862_v50 = vsel %vm2112_vm7, 0, %v2111_v47 }
 0x668   : > { %v1863_v55 = vsub.s32 32, %v1862_v50  ;;  %v1867_v59 = vsub.s32 4294967266, %v1862_v50  ;;  %v1864_v61 = vshll.u32 %v1855_v45, %v1862_v50  ;;  %v1877_v45 = vsub.s32 4, %v3056_v14 }
 0x669   : > { %v1724_v42 = vmul.f32 %v1723_v57, %v1721_v27  ;;  %v1731_v44 = vmul.f32 %v1730_v33, %v1721_v27 }
 0x66a   : > { %v1865_v0 = vshrl.u32 %v1847_v7, %v1863_v55  ;;  %v1868_v2 = vadd.s32 127, %v1867_v59  ;;  %v1878_v54 = vsel %vm1755_vm11, %v1877_v45, %v3056_v14  ;;  %v2450_v55 = vmov -1.0  }
 0x66b   : > { %v1725_v20 = vadd.f32 -0.4999988, %v1724_v42  ;;  %v1732_v40 = vadd.f32 -0.16666654, %v1731_v44  ;;  %v1880_v37 = vsel %vm3090_vm12, 0, %v1878_v54  ;;  %v2259_v42 = vpop.eup %2258 }
 0x66c   : > { %v1866_v5 = vor.u32 %v1865_v0, %v1864_v61  ;;  %v1869_v1 = vshll.u32 %v1868_v2, 23  ;;  %v1908_v61 = vstv %s1751_s6  ;;  %s3222_s6 = sld [smem:[#allocation28_spill]] }
 0x66d   : > { %v1726_v25 = vmul.f32 %v1725_v20, %v1721_v27  ;;  %v1733_v53 = vmul.f32 %v1732_v40, %v1721_v27  ;;  %v1897_v20 = vadd.s32 3, %v1880_v37 }
 0x66e   : > { %v1870_v60 = vor.u32 4788187, %v1869_v1  ;;  %v1873_v16 = vcvt.s32.f32 %v1866_v5  ;;  %v1917_v1 = vstv %s1916_s21 }
 0x66f   : > { %v1727_v15 = vadd.f32 1.0, %v1726_v25  ;;  %v1734_v21 = vadd.f32 1.0, %v1733_v53  ;;  %v1898_v50 = vand.u32 3, %v1897_v20 }
 0x670   : > { %v1871_v11 = vand.u32 2147483647, %v1870_v60 }
 0x671   : > { %v1735_v43 = vmul.f32 %v1734_v21, %v1719_v48  ;;  %v1744_v3 = vxor.u32 2147483648, %v1727_v15  ;;  %v1575_v48 = vmul.f32 %v1574_v17, %v3058_v29  ;;  %vm1900_vm13 = vcmp.eq.s32.totalorder %v1898_v50, 0 }
 0x672   : > { %v1874_v58 = vmul.f32 %v1873_v16, %v1871_v11  ;;  %vm1903_vm14 = vcmp.eq.s32.totalorder %v1898_v50, 2  ;;  %vm1899_vm15 = vcmp.lt.s32.totalorder %v1898_v50, 2 }
 0x673   : > { %v1741_v36 = vxor.u32 2147483648, %v1735_v43  ;;  %v1745_v30 = vsel %vm1743_vm1, %v1744_v3, %v1735_v43  ;;  %v1576_v32 = vadd.f32 0.2548296, %v1575_v48  ;;  %v1547_v3 = vmul.f32 0.5, %v2894_v28 }
 0x674   : > { %v1875_v24 = vxor.u32 2147483648, %v1874_v58 }
 0x675   : > { %v1742_v6 = vsel %vm1740_vm8, %v1727_v15, %v1741_v36  ;;  %v1577_v4 = vmul.f32 %v1576_v32, %v3058_v29 }
 0x676   : > { %v1746_v10 = vsel %vm1739_vm9, %v1742_v6, %v1745_v30  ;;  %v1876_v27 = vsel %vm1755_vm11, %v1875_v24, %v1874_v58 }
 0x677   : > { %v1747_v19 = vsel %vm1736_vm10, nan, %v1746_v10  ;;  %v1879_v62 = vsel %vm3090_vm12, %v2885_v9, %v1876_v27  ;;  %v1582_v49 = vmul.f32 %v2259_v42, %v1577_v4  ;;  %v2219_v27 = vld [vmem:[%s3222_s6] ss:$0 sm:$0xff] }
 0x678   : > { %v1749_v23 = vmul.f32 %v1748_v8, %v1747_v19  ;;  %v1881_v13 = vmul.f32 %v1879_v62, %v1879_v62 }
 0x679   : > { %v1583_v14 = vsub.f32 1.0, %v1582_v49 }
 0x67a   : > { %1750 = vst.msk [vmem:[#allocation2] sm:$0xff] %vm771_vm2, %v1749_v23  ;;  %v1882_v35 = vmul.f32 -0.001358992, %v1881_v13  ;;  %v1889_v52 = vmul.f32 -0.00019511016, %v1881_v13  ;;  %vm1549_vm2 = vcmp.ge.f32.partialorder %v2897_v38, 0.0 }
 0x67b   : > { %v1550_v59 = vsel %vm1549_vm2, 1.0, %v2450_v55 }
 0x67c   : > { %v1883_v57 = vadd.f32 0.041655596, %v1882_v35  ;;  %v1890_v33 = vadd.f32 0.008332121, %v1889_v52  ;;  %v1584_v15 = vmul.f32 %v1583_v14, %v1550_v59 }
 0x67e   : > { %v1884_v34 = vmul.f32 %v1883_v57, %v1881_v13  ;;  %v1891_v41 = vmul.f32 %v1890_v33, %v1881_v13  ;;  %v1585_v2 = vadd.f32 1.0, %v1584_v15 }
 0x680   : > { %v1885_v44 = vadd.f32 -0.4999988, %v1884_v34  ;;  %v1892_v47 = vadd.f32 -0.16666654, %v1891_v41  ;;  %v1586_v5 = vmul.f32 %v1585_v2, %v1547_v3 }
 0x682   : > { %v1886_v40 = vmul.f32 %v1885_v44, %v1881_v13  ;;  %v1893_v63 = vmul.f32 %v1892_v47, %v1881_v13  ;;  %v1918_v39 = vmul.f32 %v1917_v1, %v1586_v5 }
 0x684   : > { %v1887_v25 = vadd.f32 1.0, %v1886_v40  ;;  %v1894_v53 = vadd.f32 1.0, %v1893_v63 }
 0x686   : > { %v1895_v29 = vmul.f32 %v1894_v53, %v1879_v62  ;;  %v1904_v7 = vxor.u32 2147483648, %v1887_v25 }
 0x688   : > { %v1901_v12 = vxor.u32 2147483648, %v1895_v29  ;;  %v1905_v56 = vsel %vm1903_vm14, %v1904_v7, %v1895_v29 }
 0x68a   : > { %v1902_v21 = vsel %vm1900_vm13, %v1887_v25, %v1901_v12 }
 0x68b   : > { %v1906_v0 = vsel %vm1899_vm15, %v1902_v21, %v1905_v56 }
 0x68c   : > { %v1907_v38 = vsel %vm1896_vm3, nan, %v1906_v0 }
 0x68d   : > { %v1909_v43 = vmul.f32 %v1908_v61, %v1907_v38 }
 0x68f   : > { %1911 = vrot.lane.b32.xlu2 %v1909_v43, %s2437_s25  ;;  %s2114_s25 = sshll.u32 %s2578_s3, 3  ;;  %s653_s3 = scalar_lea.vmem [#allocation10], %s2073_s24 }
 0x690   : > { %s1971_s22 = scalar_lea.hbm %s3220_s19, %s2114_s25  ;;  %s1973_s21 = sshll.u32 %s653_s3, 4  ;;  %s1974_s21 = int_to_ptr.vmem [resolvable:$true] %s1973_s21 }
 0x691   : > { %s1975_s4 = sshll.u32 %s1971_s22, 4  ;;  %s2372_s24 = scalar_lea.hbm %s3220_s19, 16  ;;  %s1976_s4 = int_to_ptr.hbm [resolvable:$true] %s1975_s4 }
 0x692   : > { %s2366_s23 = sshra.s32 %s1976_s4, 4  ;;  %s2367_s23 = int_to_ptr.hbm [resolvable:$true] %s2366_s23 }
 0x693   : > { %s2368_s25 = scalar_lea.hbm %s2367_s23, 8  ;;  %p2373_p12 = scmp.lt.s32.totalorder %s2367_s23, %s3220_s19 }
 0x694   : > { %p2369_p1 = scmp.ne.s32.totalorder %s2367_s23, %s2368_s25  ;;  %p2374_p7 = scmp.lt.s32.totalorder %s2372_s24, %s2368_s25 }
 0x696   : > { %p2370_p3 = pnand %p2369_p1, %p2623_p4  ;;  %p2375_p8 = por %p2374_p7, %p2373_p12 }
 0x697   : > { %1920 = vrot.lane.b32.xlu2 %v1918_v39, %s2439_s0  ;;  %s1961_s0 = scalar_lea.sflag [#allocation6], %s2654_s28 }
 0x698   : > { %p2371_p5 = pneg %p2370_p3 }
 0x69a   : > { %p2376_p9 = pnand %p2375_p8, %p2371_p5 }
 0x6e9   : > { %v1912_v36 = vpop.permute.xlu2 %1911 }
 0x6ea   : > { %1915 = vst.msk [vmem:[#allocation2] sm:$0xff] %vm1914_vm4, %v1912_v36 }
 0x6f1   : > { %v1921_v46 = vpop.permute.xlu2 %1920 }
 0x6f2   : > { %1924 = vst.msk [vmem:[#allocation2] sm:$0xff] %vm1923_vm5, %v1921_v46 }
 0x6f9   : > { %v1925_v9 = vld [vmem:[#allocation2] sm:$0xff] }
 0x6fa   : > { %v1926_v60 = vadd.f32 %v1925_v9, %v2870_v31 }
 0x6fc   : > { %v1929_v6 = vsel %vm663_vm0, %v1926_v60, 0.0 }
 0x6fd   : > { %1930 = vadd.xlane.f32.xlu2 %v1929_v6 }
 0x770   : > { %v1931_v28 = vpop.xlane.xlu2 %1930 }
 0x771   : > { %v1932_v30 = vmul.f32 %v1931_v28, %v2835_v51 }
 0x773   : > { %v1933_v8 = vsub.f32 %v1926_v60, %v1932_v30 }
 0x775   : > { %v1934_v10 = vmul.f32 %v1933_v8, %v1933_v8 }
 0x777   : > { %v1935_v11 = vsel %vm663_vm0, %v1934_v10, 0.0 }
 0x778   : > { %1936 = vadd.xlane.f32.xlu1 %v1935_v11 }
 0x7eb   : > { %v1937_v16 = vpop.xlane.xlu1 %1936 }
 0x7ec   : > { %v1938_v17 = vmul.f32 %v1937_v16, %v2835_v51 }
 0x7ee   : > { %v1939_v19 = vadd.f32 1e-05, %v1938_v17 }
 0x7f0   : > { %2260 = vrsqrt.f32 %v1939_v19  ;;  %vm1946_vm7 = vweird.f32 %v1939_v19 }
 0x7f6   : > { %v2261_v22 = vpop.eup %2260 }
 0x7f7   : > { %v1941_v31 = vmul.f32 %v2261_v22, %v1939_v19  ;;  %vm1947_vm6 = vweird.f32 %v2261_v22 }
 0x7f8   : > { %vm1948_vm8 = vmor %vm1946_vm7, %vm1947_vm6 }
 0x7f9   : > { %v1942_v23 = vmul.f32 %v2261_v22, %v1941_v31 }
 0x7fb   : > { %v1943_v58 = vmul.f32 0.5, %v1942_v23 }
 0x7fd   : > { %v1944_v24 = vsub.f32 1.5, %v1943_v58 }
 0x7ff   : > { %v1945_v48 = vmul.f32 %v2261_v22, %v1944_v24 }
 0x801   : > { %v1949_v51 = vsel %vm1948_vm8, %v2261_v22, %v1945_v48 }
 0x802   : > { %v1950_v18 = vmul.f32 %v1949_v51, %v1933_v8 }
 0x804   : > { %v1954_v45 = vmul.f32 %v2218_v26, %v1950_v18 }
 0x806   : > { %v1958_v62 = vadd.f32 %v2219_v27, %v1954_v45 }
 0x808   : > { %1959 = vst.msk [vmem:[%s653_s3] sm:$0xff] %vm663_vm0, %v1958_v62 }
 0x809   : > { %2379 = shalt.err (!%p2376_p9)
}
 0x80a   : > { %2127 = dma.vmem_to_hbm [thread:$0]  (%p2623_p4), %s1974_s21, 128, %s1976_s4, %s1961_s0  }
 0x80b PF: > { %s3223_s28 = sld [smem:[#allocation14_spill]]  ;;  %p3225_p10 = scmp.ge.s32.totalorder %s2422_s2, 2 }
 0x80d   : > { %p2141_p13 = pnand %p3225_p10, %p2627_p6 }
 0x80f   : > { %p2142_p11 = pneg %p2141_p13 }
 0x811   : > { %s1987_s29 = sand.u32 1, %s3223_s28  }
 0x812   : > { %s1988_s6 = scalar_lea.sflag [#allocation6], %s1987_s29 }
 0x813   : > { %2405 = dma.done.wait (%p2142_p11), %s1988_s6, 128  }
 0x814   : > { %2407 = vsyncadd (%p2142_p11), %s1988_s6, 4294967168  ;;  %s3226_s2 = sld [smem:[#allocation16_spill]]  ;;  %s3229_s21 = smov %s2414_s1 }
 0x815   : > { %s3227_s3 = sld [smem:[#allocation15_spill]] }
 0x816   : > { %s3228_s22 = sld [smem:[#allocation17_spill]] }
 0x81a   : > { %p34_p0 = scmp.ge.s32.totalorder %s3226_s2, 4  }
 0x81b   : > { %s3230_s1 = smov %s3227_s3 }
 0x81c   :  { %36 = sbr.rel (!%p34_p0) target bundleno = 24 (0x18), region = 149 }
 0x821   :  { %1994 = vsyncpa [#allocation5], 1 }
 0x822   :  { %1996 = vsyncpa [#allocation5 + $0x1], 1 }
 0x823   :  { %1997 = vsyncpa [#allocation8], 1 }
 0x824   :  { %1998 = vsyncpa [#allocation6], 1 }
 0x825   :  { %2000 = vsyncpa [#allocation6 + $0x1], 1 }

</bundles_post_ra>
